<compile_context>
chip_gen: v5e
topology: v5e:2x2
jax: 0.10.0
libtpu: 0.0.40
codegen_flags: <defaults>
</compile_context>

<pallas_src>
import functools

import jax
import jax.numpy as jnp
from jax import lax
from jax.experimental import pallas as pl
from jax.experimental.pallas import tpu as pltpu


def _round_up(x, m):
    return ((x + m - 1) // m) * m


def _birnn_kernel(emb_ref, mask_ref, wih_ref, b_ref, whh_ref,
                  wht_f_ref, wht_b_ref, bht_ref,
                  out_ref,
                  xg_ref, hid_f_ref, hid_b_ref,
                  *, seq_len, batch_p):
    """Bidirectional packed-LSTM + hidden2tag, flat (8-padded) time-major layout.

    emb_ref  : [T*Bp, 2E]   row t*Bp+b = [emb(b,t) | emb(b,T-1-t)]
    mask_ref : [T*Bp, 2H2]  lanes :H2 = mask(b,t), lanes H2: = mask(b,T-1-t)
    wih_ref  : [2E, 8H2]    fused/permuted input weights (+zero cross blocks)
    b_ref    : [1, 8H2]     fused biases (b_ih + b_hh, both directions)
    whh_ref  : [2H2, 8H2]   block-diagonal recurrent weights
    wht_*    : [H2, TSp]    hidden2tag halves, zero-padded to 128 lanes
    bht_ref  : [1, TSp]
    out_ref  : [T*Bp, TSp]
    xg_ref   : [T*Bp, 8H2]  VMEM scratch (hoisted input-gate pre-activations)
    hid_*_ref: [T*Bp, H2]   VMEM scratch (masked hidden outputs, normal order)

    Gate column order (each block H2 lanes): i_f i_b | f_f f_b | g_f g_b | o_f o_b
    """
    T, Bp = seq_len, batch_p
    H2 = whh_ref.shape[0] // 2
    G = 2 * H2                                   # one gate group (fwd|bwd)

    # ---- (1) Hoisted input projection: one 128-lane MXU matmul for ALL ------
    # timesteps and BOTH directions, biases folded in.
    xg_ref[...] = (jnp.dot(emb_ref[...], wih_ref[...],
                           preferred_element_type=jnp.float32)
                   + b_ref[...])                 # [T*Bp, 8H2]

    whh = whh_ref[...]                           # [2H2, 8H2] block-diagonal

    h = jnp.zeros((Bp, G), jnp.float32)          # [hf | hb]  (vreg-resident)
    c = jnp.zeros((Bp, G), jnp.float32)          # [cf | cb]

    # ---- (2) Fused fwd/bwd recurrence: ONE matmul per step ------------------
    # Loop step t processes time t for the forward direction and time T-1-t for
    # the backward direction (its inputs/mask were pre-flipped in the wrapper).
    for t in range(T):
        r = pl.ds(t * Bp, Bp)
        gates = xg_ref[r] + jnp.dot(h, whh,
                                    preferred_element_type=jnp.float32)  # [Bp, 8H2]
        i_g = jax.nn.sigmoid(gates[:, 0 * G:1 * G])
        f_g = jax.nn.sigmoid(gates[:, 1 * G:2 * G])
        g_g = jnp.tanh(gates[:, 2 * G:3 * G])
        o_g = jax.nn.sigmoid(gates[:, 3 * G:4 * G])
        c_new = f_g * c + i_g * g_g
        h_new = o_g * jnp.tanh(c_new)

        # Packed-sequence semantics: padded steps hold state, emit zeros.
        m = mask_ref[r] != 0.0                   # [Bp, 2H2] bool
        h = jnp.where(m, h_new, h)
        c = jnp.where(m, c_new, c)
        h_out = jnp.where(m, h_new, 0.0)

        hid_f_ref[r] = h_out[:, :H2]             # time t (normal order)
        hid_b_ref[pl.ds((T - 1 - t) * Bp, Bp)] = h_out[:, H2:]   # time T-1-t

    # ---- (3) Hoisted hidden2tag: two batched matmuls, one lane-dense store --
    # Padded rows have zero hidden state -> emission = bias (matches
    # pad_packed_sequence + Linear). Padded tag columns have zero weight/bias.
    out_ref[...] = (jnp.dot(hid_f_ref[...], wht_f_ref[...],
                            preferred_element_type=jnp.float32)
                    + jnp.dot(hid_b_ref[...], wht_b_ref[...],
                              preferred_element_type=jnp.float32)
                    + bht_ref[...])


def _interleave_gates(mat_f, mat_b, h2):
    """Interleave gate blocks (i,f,g,o) of two [rows, 4*h2] matrices into
    [rows, 8*h2] with column order i_f|i_b|f_f|f_b|g_f|g_b|o_f|o_b."""
    blocks = []
    for k in range(4):
        blocks.append(mat_f[:, k * h2:(k + 1) * h2])
        blocks.append(mat_b[:, k * h2:(k + 1) * h2])
    return jnp.concatenate(blocks, axis=1)


@jax.jit
def birnn_forward(embeddings, lengths, params):
    """embeddings: [B, T, E] (padded, batch_first), lengths: [B] int32.

    Returns (emissions [B, T, TS], lengths) — same as the PyTorch forward().
    """
    B, T, E = embeddings.shape
    TS = params["wht"].shape[0]
    H2 = params["whh_f"].shape[1]
    Bp = _round_up(B, 8)                 # sublane-aligned batch stride
    TSp = _round_up(TS, 128)             # lane-dense output width

    mask = (jnp.arange(T)[None, :] < lengths[:, None]).astype(jnp.float32)  # [B,T]

    # Flat time-major layout with padded batch stride: row index = t*Bp + b.
    emb_tbe = jnp.transpose(embeddings, (1, 0, 2))                   # [T,B,E]
    emb_p = jnp.pad(emb_tbe, ((0, 0), (0, Bp - B), (0, 0)))          # [T,Bp,E]
    emb_fwd = emb_p.reshape(T * Bp, E)
    emb_bwd = emb_p[::-1].reshape(T * Bp, E)                         # time-reversed
    emb_cat = jnp.concatenate([emb_fwd, emb_bwd], axis=1)            # [T*Bp, 2E]

    mask_tbp = jnp.pad(mask.T, ((0, 0), (0, Bp - B)))                # [T,Bp]
    m_f = jnp.broadcast_to(mask_tbp[:, :, None], (T, Bp, H2))
    m_b = jnp.broadcast_to(mask_tbp[::-1][:, :, None], (T, Bp, H2))
    mask_cat = jnp.concatenate([m_f, m_b], axis=2).reshape(T * Bp, 2 * H2)

    # Pre-fused / pre-transposed weights (gate order i,f,g,o per PyTorch).
    wih_f_t = params["wih_f"].T                                      # [E, 4H2]
    wih_b_t = params["wih_b"].T
    wih_all = jnp.concatenate(
        [_interleave_gates(wih_f_t, jnp.zeros_like(wih_f_t), H2),
         _interleave_gates(jnp.zeros_like(wih_b_t), wih_b_t, H2)],
        axis=0)                                                      # [2E, 8H2]
    b_all = _interleave_gates(params["b_f"], params["b_b"], H2)      # [1, 8H2]

    whh_f_t = params["whh_f"].T                                      # [H2, 4H2]
    whh_b_t = params["whh_b"].T
    whh_bd = jnp.concatenate(
        [_interleave_gates(whh_f_t, jnp.zeros_like(whh_f_t), H2),
         _interleave_gates(jnp.zeros_like(whh_b_t), whh_b_t, H2)],
        axis=0)                                                      # [2H2, 8H2]

    wht_t = params["wht"].T                                          # [2H2, TS]
    wht_f_tp = jnp.pad(wht_t[:H2], ((0, 0), (0, TSp - TS)))          # [H2, TSp]
    wht_b_tp = jnp.pad(wht_t[H2:], ((0, 0), (0, TSp - TS)))
    bht_p = jnp.pad(params["bht"], ((0, 0), (0, TSp - TS)))          # [1, TSp]

    flops = (2 * (T * Bp) * (2 * E) * (8 * H2)        # hoisted input projection
             + 2 * (T * Bp) * (2 * H2) * (8 * H2)     # recurrent matmuls
             + 2 * 2 * (T * Bp) * H2 * TSp)           # hidden2tag
    transcendentals = T * Bp * 10 * H2
    bytes_accessed = 4 * (T * Bp * (2 * E + 2 * H2 + TSp)
                          + 2 * E * 8 * H2 + 8 * H2
                          + 2 * H2 * 8 * H2 + 2 * H2 * TSp + TSp)

    vmem = pl.BlockSpec(memory_space=pltpu.MemorySpace.VMEM)
    kernel = functools.partial(_birnn_kernel, seq_len=T, batch_p=Bp)

    out_flat = pl.pallas_call(
        kernel,
        out_shape=jax.ShapeDtypeStruct((T * Bp, TSp), jnp.float32),
        in_specs=[vmem] * 8,
        out_specs=vmem,
        scratch_shapes=[pltpu.VMEM((T * Bp, 8 * H2), jnp.float32),
                        pltpu.VMEM((T * Bp, H2), jnp.float32),
                        pltpu.VMEM((T * Bp, H2), jnp.float32)],
        cost_estimate=pl.CostEstimate(flops=flops,
                                      transcendentals=transcendentals,
                                      bytes_accessed=bytes_accessed),
    )(emb_cat, mask_cat, wih_all, b_all, whh_bd, wht_f_tp, wht_b_tp, bht_p)

    emissions = jnp.transpose(
        out_flat.reshape(T, Bp, TSp)[:, :B, :TS], (1, 0, 2))          # [B,T,TS]
    return emissions, lengths


def birnn_forward_ref(embeddings, lengths, params):
    """Pure-JAX reference (lax.scan) with identical packed-LSTM semantics."""
    B, T, E = embeddings.shape
    H2 = params["whh_f"].shape[1]
    mask = (jnp.arange(T)[None, :] < lengths[:, None]).astype(jnp.float32)

    def make_step(wih, whh, b):
        def step(carry, inp):
            h, c = carry
            x_t, m_t = inp
            m = m_t[:, None]
            gates = x_t @ wih.T + h @ whh.T + b
            i_g = jax.nn.sigmoid(gates[:, 0 * H2:1 * H2])
            f_g = jax.nn.sigmoid(gates[:, 1 * H2:2 * H2])
            g_g = jnp.tanh(gates[:, 2 * H2:3 * H2])
            o_g = jax.nn.sigmoid(gates[:, 3 * H2:4 * H2])
            c_new = f_g * c + i_g * g_g
            h_new = o_g * jnp.tanh(c_new)
            h = m * h_new + (1.0 - m) * h
            c = m * c_new + (1.0 - m) * c
            return (h, c), h_new * m
        return step

    emb_tbe = jnp.transpose(embeddings, (1, 0, 2))
    mask_tb = jnp.transpose(mask, (1, 0))
    init = (jnp.zeros((B, H2), jnp.float32), jnp.zeros((B, H2), jnp.float32))

    _, out_f = lax.scan(make_step(params["wih_f"], params["whh_f"], params["b_f"]),
                        init, (emb_tbe, mask_tb))
    _, out_b_rev = lax.scan(make_step(params["wih_b"], params["whh_b"], params["b_b"]),
                            init, (emb_tbe[::-1], mask_tb[::-1]))
    out_b = out_b_rev[::-1]
    lstm_out = jnp.concatenate([out_f, out_b], axis=-1)          # [T, B, 2*H2]
    lstm_out = jnp.transpose(lstm_out, (1, 0, 2))                # [B, T, 2*H2]
    emissions = lstm_out @ params["wht"].T + params["bht"]
    return emissions, lengths


def init_params(key, embedding_dim, hidden_dim, tagset_size):
    H2 = hidden_dim // 2
    k = 1.0 / jnp.sqrt(H2)
    keys = jax.random.split(key, 12)

    def u(kk, shape):
        return jax.random.uniform(kk, shape, jnp.float32, -k, k)

    # PyTorch LSTM params per direction: W_ih [4H2, E], W_hh [4H2, H2],
    # b_ih + b_hh -> combined bias [1, 4H2].
    params = {
        "wih_f": u(keys[0], (4 * H2, embedding_dim)),
        "whh_f": u(keys[1], (4 * H2, H2)),
        "b_f":   (u(keys[2], (1, 4 * H2)) + u(keys[3], (1, 4 * H2))),
        "wih_b": u(keys[4], (4 * H2, embedding_dim)),
        "whh_b": u(keys[5], (4 * H2, H2)),
        "b_b":   (u(keys[6], (1, 4 * H2)) + u(keys[7], (1, 4 * H2))),
        # hidden2tag: Linear(hidden_dim, tagset_size)
        "wht":   jax.random.uniform(keys[8], (tagset_size, hidden_dim),
                                    jnp.float32, -1.0 / jnp.sqrt(hidden_dim),
                                    1.0 / jnp.sqrt(hidden_dim)),
        "bht":   jax.random.uniform(keys[9], (1, tagset_size), jnp.float32,
                                    -1.0 / jnp.sqrt(hidden_dim),
                                    1.0 / jnp.sqrt(hidden_dim)),
    }
    return params


if __name__ == "__main__":
    # Small shapes consistent with the module: fasttext dim E=32,
    # hidden_dim=32 (H2=16 per direction), tagset=5, batch=2, seq=8.
    B, T, E = 2, 8, 32
    HIDDEN_DIM, TAGSET = 32, 5

    key = jax.random.PRNGKey(0)
    k_emb, k_par = jax.random.split(key)

    lengths = jnp.array([8, 5], dtype=jnp.int32)
    embeddings = jax.random.normal(k_emb, (B, T, E), jnp.float32)
    # embed_tokens pads with 0.0 beyond each sequence length:
    pad_mask = (jnp.arange(T)[None, :] < lengths[:, None])[:, :, None]
    embeddings = jnp.where(pad_mask, embeddings, 0.0)

    params = init_params(k_par, E, HIDDEN_DIM, TAGSET)

    emissions, out_lengths = birnn_forward(embeddings, lengths, params)
    emissions = jax.block_until_ready(emissions)

    emissions_ref, _ = birnn_forward_ref(embeddings, lengths, params)
    assert emissions.shape == (B, T, TAGSET)
    assert jnp.allclose(emissions, emissions_ref, atol=1e-4, rtol=1e-4), (
        float(jnp.max(jnp.abs(emissions - emissions_ref))))

    print("KERNEL_OK")
</pallas_src>

<mosaic_0001>
module attributes {stable_mosaic.version = 11 : i64} {
  func.func @_birnn_kernel(%arg0: memref<64x64xf32, #tpu.memory_space<vmem>>, %arg1: memref<64x32xf32, #tpu.memory_space<vmem>>, %arg2: memref<64x128xf32, #tpu.memory_space<vmem>>, %arg3: memref<1x128xf32, #tpu.memory_space<vmem>>, %arg4: memref<32x128xf32, #tpu.memory_space<vmem>>, %arg5: memref<16x128xf32, #tpu.memory_space<vmem>>, %arg6: memref<16x128xf32, #tpu.memory_space<vmem>>, %arg7: memref<1x128xf32, #tpu.memory_space<vmem>>, %arg8: memref<64x128xf32, #tpu.memory_space<vmem>>, %arg9: memref<64x128xf32, #tpu.memory_space<vmem>>, %arg10: memref<64x16xf32, #tpu.memory_space<vmem>>, %arg11: memref<64x16xf32, #tpu.memory_space<vmem>>) attributes {dimension_semantics = [], scalar_prefetch = 0 : i64, scratch_operands = 3 : i64, tpu.core_type = #tpu.core_type<tc>} {
    %c0 = arith.constant 0 : index
    %c0_0 = arith.constant 0 : index
    %0 = vector.load %arg0[%c0, %c0_0] : memref<64x64xf32, #tpu.memory_space<vmem>>, vector<64x64xf32>
    %c0_1 = arith.constant 0 : index
    %c0_2 = arith.constant 0 : index
    %1 = vector.load %arg2[%c0_1, %c0_2] : memref<64x128xf32, #tpu.memory_space<vmem>>, vector<64x128xf32>
    %cst = arith.constant dense<0.000000e+00> : vector<64x128xf32>
    %2 = tpu.matmul %0, %1, %cst {dimension_numbers = #tpu.dot_dimension_numbers<[1], [0], [0], [1], [0, 0, 1, 1], [], []>} : vector<64x64xf32>, vector<64x128xf32>, vector<64x128xf32> -> vector<64x128xf32>
    %c0_3 = arith.constant 0 : index
    %c0_4 = arith.constant 0 : index
    %3 = vector.load %arg3[%c0_3, %c0_4] : memref<1x128xf32, #tpu.memory_space<vmem>>, vector<1x128xf32>
    %4 = vector.broadcast %3 : vector<1x128xf32> to vector<64x128xf32>
    %5 = arith.addf %2, %4 : vector<64x128xf32>
    %c0_5 = arith.constant 0 : index
    %c0_6 = arith.constant 0 : index
    %6 = vector.load %arg9[%c0_5, %c0_6] : memref<64x128xf32, #tpu.memory_space<vmem>>, vector<64x128xf32>
    tpu.vector_store %arg9[%c0_5, %c0_6], %5 {strides = array<i32>} : memref<64x128xf32, #tpu.memory_space<vmem>>, vector<64x128xf32>,
    %c0_7 = arith.constant 0 : index
    %c0_8 = arith.constant 0 : index
    %7 = vector.load %arg4[%c0_7, %c0_8] : memref<32x128xf32, #tpu.memory_space<vmem>>, vector<32x128xf32>
    %cst_9 = arith.constant 0.000000e+00 : f32
    %8 = vector.broadcast %cst_9 : f32 to vector<8x32xf32>
    %cst_10 = arith.constant 0.000000e+00 : f32
    %9 = vector.broadcast %cst_10 : f32 to vector<8x32xf32>
    %c0_11 = arith.constant 0 : index
    %c0_12 = arith.constant 0 : index
    %10 = vector.load %arg9[%c0_11, %c0_12] : memref<64x128xf32, #tpu.memory_space<vmem>>, vector<8x128xf32>
    %cst_13 = arith.constant dense<0.000000e+00> : vector<8x128xf32>
    %11 = tpu.matmul %8, %7, %cst_13 {dimension_numbers = #tpu.dot_dimension_numbers<[1], [0], [0], [1], [0, 0, 1, 1], [], []>} : vector<8x32xf32>, vector<32x128xf32>, vector<8x128xf32> -> vector<8x128xf32>
    %12 = arith.addf %10, %11 : vector<8x128xf32>
    %13 = vector.extract_strided_slice %12 {offsets = [0, 0], sizes = [8, 32], strides = [1, 1]} : vector<8x128xf32> to vector<8x32xf32>
    %14 = arith.negf %13 : vector<8x32xf32>
    %15 = math.exp %14 : vector<8x32xf32>
    %cst_14 = arith.constant 1.000000e+00 : f32
    %16 = vector.broadcast %cst_14 : f32 to vector<8x32xf32>
    %17 = arith.addf %16, %15 : vector<8x32xf32>
    %18 = arith.divf %16, %17 : vector<8x32xf32>
    %19 = vector.extract_strided_slice %12 {offsets = [0, 32], sizes = [8, 32], strides = [1, 1]} : vector<8x128xf32> to vector<8x32xf32>
    %20 = arith.negf %19 : vector<8x32xf32>
    %21 = math.exp %20 : vector<8x32xf32>
    %cst_15 = arith.constant 1.000000e+00 : f32
    %22 = vector.broadcast %cst_15 : f32 to vector<8x32xf32>
    %23 = arith.addf %22, %21 : vector<8x32xf32>
    %24 = arith.divf %22, %23 : vector<8x32xf32>
    %25 = vector.extract_strided_slice %12 {offsets = [0, 64], sizes = [8, 32], strides = [1, 1]} : vector<8x128xf32> to vector<8x32xf32>
    %26 = math.tanh %25 : vector<8x32xf32>
    %27 = vector.extract_strided_slice %12 {offsets = [0, 96], sizes = [8, 32], strides = [1, 1]} : vector<8x128xf32> to vector<8x32xf32>
    %28 = arith.negf %27 : vector<8x32xf32>
    %29 = math.exp %28 : vector<8x32xf32>
    %cst_16 = arith.constant 1.000000e+00 : f32
    %30 = vector.broadcast %cst_16 : f32 to vector<8x32xf32>
    %31 = arith.addf %30, %29 : vector<8x32xf32>
    %32 = arith.divf %30, %31 : vector<8x32xf32>
    %33 = arith.mulf %24, %9 : vector<8x32xf32>
    %34 = arith.mulf %18, %26 : vector<8x32xf32>
    %35 = arith.addf %33, %34 : vector<8x32xf32>
    %36 = math.tanh %35 : vector<8x32xf32>
    %37 = arith.mulf %32, %36 : vector<8x32xf32>
    %c0_17 = arith.constant 0 : index
    %c0_18 = arith.constant 0 : index
    %38 = vector.load %arg1[%c0_17, %c0_18] : memref<64x32xf32, #tpu.memory_space<vmem>>, vector<8x32xf32>
    %cst_19 = arith.constant 0.000000e+00 : f32
    %39 = vector.broadcast %cst_19 : f32 to vector<8x32xf32>
    %40 = arith.cmpf one, %38, %39 : vector<8x32xf32>
    %41 = arith.select %40, %37, %8 : vector<8x32xi1>, vector<8x32xf32>
    %42 = arith.select %40, %35, %9 : vector<8x32xi1>, vector<8x32xf32>
    %cst_20 = arith.constant 0.000000e+00 : f32
    %43 = vector.broadcast %cst_20 : f32 to vector<8x32xf32>
    %44 = arith.select %40, %37, %43 : vector<8x32xi1>, vector<8x32xf32>
    %45 = vector.extract_strided_slice %44 {offsets = [0, 0], sizes = [8, 16], strides = [1, 1]} : vector<8x32xf32> to vector<8x16xf32>
    %c0_21 = arith.constant 0 : index
    %c0_22 = arith.constant 0 : index
    %46 = vector.load %arg10[%c0_21, %c0_22] : memref<64x16xf32, #tpu.memory_space<vmem>>, vector<8x16xf32>
    tpu.vector_store %arg10[%c0_21, %c0_22], %45 {strides = array<i32>} : memref<64x16xf32, #tpu.memory_space<vmem>>, vector<8x16xf32>,
    %47 = vector.extract_strided_slice %44 {offsets = [0, 16], sizes = [8, 16], strides = [1, 1]} : vector<8x32xf32> to vector<8x16xf32>
    %c56 = arith.constant 56 : index
    %c0_23 = arith.constant 0 : index
    %48 = vector.load %arg11[%c56, %c0_23] : memref<64x16xf32, #tpu.memory_space<vmem>>, vector<8x16xf32>
    tpu.vector_store %arg11[%c56, %c0_23], %47 {strides = array<i32>} : memref<64x16xf32, #tpu.memory_space<vmem>>, vector<8x16xf32>,
    %c8 = arith.constant 8 : index
    %c0_24 = arith.constant 0 : index
    %49 = vector.load %arg9[%c8, %c0_24] : memref<64x128xf32, #tpu.memory_space<vmem>>, vector<8x128xf32>
    %cst_25 = arith.constant dense<0.000000e+00> : vector<8x128xf32>
    %50 = tpu.matmul %41, %7, %cst_25 {dimension_numbers = #tpu.dot_dimension_numbers<[1], [0], [0], [1], [0, 0, 1, 1], [], []>} : vector<8x32xf32>, vector<32x128xf32>, vector<8x128xf32> -> vector<8x128xf32>
    %51 = arith.addf %49, %50 : vector<8x128xf32>
    %52 = vector.extract_strided_slice %51 {offsets = [0, 0], sizes = [8, 32], strides = [1, 1]} : vector<8x128xf32> to vector<8x32xf32>
    %53 = arith.negf %52 : vector<8x32xf32>
    %54 = math.exp %53 : vector<8x32xf32>
    %cst_26 = arith.constant 1.000000e+00 : f32
    %55 = vector.broadcast %cst_26 : f32 to vector<8x32xf32>
    %56 = arith.addf %55, %54 : vector<8x32xf32>
    %57 = arith.divf %55, %56 : vector<8x32xf32>
    %58 = vector.extract_strided_slice %51 {offsets = [0, 32], sizes = [8, 32], strides = [1, 1]} : vector<8x128xf32> to vector<8x32xf32>
    %59 = arith.negf %58 : vector<8x32xf32>
    %60 = math.exp %59 : vector<8x32xf32>
    %cst_27 = arith.constant 1.000000e+00 : f32
    %61 = vector.broadcast %cst_27 : f32 to vector<8x32xf32>
    %62 = arith.addf %61, %60 : vector<8x32xf32>
    %63 = arith.divf %61, %62 : vector<8x32xf32>
    %64 = vector.extract_strided_slice %51 {offsets = [0, 64], sizes = [8, 32], strides = [1, 1]} : vector<8x128xf32> to vector<8x32xf32>
    %65 = math.tanh %64 : vector<8x32xf32>
    %66 = vector.extract_strided_slice %51 {offsets = [0, 96], sizes = [8, 32], strides = [1, 1]} : vector<8x128xf32> to vector<8x32xf32>
    %67 = arith.negf %66 : vector<8x32xf32>
    %68 = math.exp %67 : vector<8x32xf32>
    %cst_28 = arith.constant 1.000000e+00 : f32
    %69 = vector.broadcast %cst_28 : f32 to vector<8x32xf32>
    %70 = arith.addf %69, %68 : vector<8x32xf32>
    %71 = arith.divf %69, %70 : vector<8x32xf32>
    %72 = arith.mulf %63, %42 : vector<8x32xf32>
    %73 = arith.mulf %57, %65 : vector<8x32xf32>
    %74 = arith.addf %72, %73 : vector<8x32xf32>
    %75 = math.tanh %74 : vector<8x32xf32>
    %76 = arith.mulf %71, %75 : vector<8x32xf32>
    %c8_29 = arith.constant 8 : index
    %c0_30 = arith.constant 0 : index
    %77 = vector.load %arg1[%c8_29, %c0_30] : memref<64x32xf32, #tpu.memory_space<vmem>>, vector<8x32xf32>
    %cst_31 = arith.constant 0.000000e+00 : f32
    %78 = vector.broadcast %cst_31 : f32 to vector<8x32xf32>
    %79 = arith.cmpf one, %77, %78 : vector<8x32xf32>
    %80 = arith.select %79, %76, %41 : vector<8x32xi1>, vector<8x32xf32>
    %81 = arith.select %79, %74, %42 : vector<8x32xi1>, vector<8x32xf32>
    %cst_32 = arith.constant 0.000000e+00 : f32
    %82 = vector.broadcast %cst_32 : f32 to vector<8x32xf32>
    %83 = arith.select %79, %76, %82 : vector<8x32xi1>, vector<8x32xf32>
    %84 = vector.extract_strided_slice %83 {offsets = [0, 0], sizes = [8, 16], strides = [1, 1]} : vector<8x32xf32> to vector<8x16xf32>
    %c8_33 = arith.constant 8 : index
    %c0_34 = arith.constant 0 : index
    %85 = vector.load %arg10[%c8_33, %c0_34] : memref<64x16xf32, #tpu.memory_space<vmem>>, vector<8x16xf32>
    tpu.vector_store %arg10[%c8_33, %c0_34], %84 {strides = array<i32>} : memref<64x16xf32, #tpu.memory_space<vmem>>, vector<8x16xf32>,
    %86 = vector.extract_strided_slice %83 {offsets = [0, 16], sizes = [8, 16], strides = [1, 1]} : vector<8x32xf32> to vector<8x16xf32>
    %c48 = arith.constant 48 : index
    %c0_35 = arith.constant 0 : index
    %87 = vector.load %arg11[%c48, %c0_35] : memref<64x16xf32, #tpu.memory_space<vmem>>, vector<8x16xf32>
    tpu.vector_store %arg11[%c48, %c0_35], %86 {strides = array<i32>} : memref<64x16xf32, #tpu.memory_space<vmem>>, vector<8x16xf32>,
    %c16 = arith.constant 16 : index
    %c0_36 = arith.constant 0 : index
    %88 = vector.load %arg9[%c16, %c0_36] : memref<64x128xf32, #tpu.memory_space<vmem>>, vector<8x128xf32>
    %cst_37 = arith.constant dense<0.000000e+00> : vector<8x128xf32>
    %89 = tpu.matmul %80, %7, %cst_37 {dimension_numbers = #tpu.dot_dimension_numbers<[1], [0], [0], [1], [0, 0, 1, 1], [], []>} : vector<8x32xf32>, vector<32x128xf32>, vector<8x128xf32> -> vector<8x128xf32>
    %90 = arith.addf %88, %89 : vector<8x128xf32>
    %91 = vector.extract_strided_slice %90 {offsets = [0, 0], sizes = [8, 32], strides = [1, 1]} : vector<8x128xf32> to vector<8x32xf32>
    %92 = arith.negf %91 : vector<8x32xf32>
    %93 = math.exp %92 : vector<8x32xf32>
    %cst_38 = arith.constant 1.000000e+00 : f32
    %94 = vector.broadcast %cst_38 : f32 to vector<8x32xf32>
    %95 = arith.addf %94, %93 : vector<8x32xf32>
    %96 = arith.divf %94, %95 : vector<8x32xf32>
    %97 = vector.extract_strided_slice %90 {offsets = [0, 32], sizes = [8, 32], strides = [1, 1]} : vector<8x128xf32> to vector<8x32xf32>
    %98 = arith.negf %97 : vector<8x32xf32>
    %99 = math.exp %98 : vector<8x32xf32>
    %cst_39 = arith.constant 1.000000e+00 : f32
    %100 = vector.broadcast %cst_39 : f32 to vector<8x32xf32>
    %101 = arith.addf %100, %99 : vector<8x32xf32>
    %102 = arith.divf %100, %101 : vector<8x32xf32>
    %103 = vector.extract_strided_slice %90 {offsets = [0, 64], sizes = [8, 32], strides = [1, 1]} : vector<8x128xf32> to vector<8x32xf32>
    %104 = math.tanh %103 : vector<8x32xf32>
    %105 = vector.extract_strided_slice %90 {offsets = [0, 96], sizes = [8, 32], strides = [1, 1]} : vector<8x128xf32> to vector<8x32xf32>
    %106 = arith.negf %105 : vector<8x32xf32>
    %107 = math.exp %106 : vector<8x32xf32>
    %cst_40 = arith.constant 1.000000e+00 : f32
    %108 = vector.broadcast %cst_40 : f32 to vector<8x32xf32>
    %109 = arith.addf %108, %107 : vector<8x32xf32>
    %110 = arith.divf %108, %109 : vector<8x32xf32>
    %111 = arith.mulf %102, %81 : vector<8x32xf32>
    %112 = arith.mulf %96, %104 : vector<8x32xf32>
    %113 = arith.addf %111, %112 : vector<8x32xf32>
    %114 = math.tanh %113 : vector<8x32xf32>
    %115 = arith.mulf %110, %114 : vector<8x32xf32>
    %c16_41 = arith.constant 16 : index
    %c0_42 = arith.constant 0 : index
    %116 = vector.load %arg1[%c16_41, %c0_42] : memref<64x32xf32, #tpu.memory_space<vmem>>, vector<8x32xf32>
    %cst_43 = arith.constant 0.000000e+00 : f32
    %117 = vector.broadcast %cst_43 : f32 to vector<8x32xf32>
    %118 = arith.cmpf one, %116, %117 : vector<8x32xf32>
    %119 = arith.select %118, %115, %80 : vector<8x32xi1>, vector<8x32xf32>
    %120 = arith.select %118, %113, %81 : vector<8x32xi1>, vector<8x32xf32>
    %cst_44 = arith.constant 0.000000e+00 : f32
    %121 = vector.broadcast %cst_44 : f32 to vector<8x32xf32>
    %122 = arith.select %118, %115, %121 : vector<8x32xi1>, vector<8x32xf32>
    %123 = vector.extract_strided_slice %122 {offsets = [0, 0], sizes = [8, 16], strides = [1, 1]} : vector<8x32xf32> to vector<8x16xf32>
    %c16_45 = arith.constant 16 : index
    %c0_46 = arith.constant 0 : index
    %124 = vector.load %arg10[%c16_45, %c0_46] : memref<64x16xf32, #tpu.memory_space<vmem>>, vector<8x16xf32>
    tpu.vector_store %arg10[%c16_45, %c0_46], %123 {strides = array<i32>} : memref<64x16xf32, #tpu.memory_space<vmem>>, vector<8x16xf32>,
    %125 = vector.extract_strided_slice %122 {offsets = [0, 16], sizes = [8, 16], strides = [1, 1]} : vector<8x32xf32> to vector<8x16xf32>
    %c40 = arith.constant 40 : index
    %c0_47 = arith.constant 0 : index
    %126 = vector.load %arg11[%c40, %c0_47] : memref<64x16xf32, #tpu.memory_space<vmem>>, vector<8x16xf32>
    tpu.vector_store %arg11[%c40, %c0_47], %125 {strides = array<i32>} : memref<64x16xf32, #tpu.memory_space<vmem>>, vector<8x16xf32>,
    %c24 = arith.constant 24 : index
    %c0_48 = arith.constant 0 : index
    %127 = vector.load %arg9[%c24, %c0_48] : memref<64x128xf32, #tpu.memory_space<vmem>>, vector<8x128xf32>
    %cst_49 = arith.constant dense<0.000000e+00> : vector<8x128xf32>
    %128 = tpu.matmul %119, %7, %cst_49 {dimension_numbers = #tpu.dot_dimension_numbers<[1], [0], [0], [1], [0, 0, 1, 1], [], []>} : vector<8x32xf32>, vector<32x128xf32>, vector<8x128xf32> -> vector<8x128xf32>
    %129 = arith.addf %127, %128 : vector<8x128xf32>
    %130 = vector.extract_strided_slice %129 {offsets = [0, 0], sizes = [8, 32], strides = [1, 1]} : vector<8x128xf32> to vector<8x32xf32>
    %131 = arith.negf %130 : vector<8x32xf32>
    %132 = math.exp %131 : vector<8x32xf32>
    %cst_50 = arith.constant 1.000000e+00 : f32
    %133 = vector.broadcast %cst_50 : f32 to vector<8x32xf32>
    %134 = arith.addf %133, %132 : vector<8x32xf32>
    %135 = arith.divf %133, %134 : vector<8x32xf32>
    %136 = vector.extract_strided_slice %129 {offsets = [0, 32], sizes = [8, 32], strides = [1, 1]} : vector<8x128xf32> to vector<8x32xf32>
    %137 = arith.negf %136 : vector<8x32xf32>
    %138 = math.exp %137 : vector<8x32xf32>
    %cst_51 = arith.constant 1.000000e+00 : f32
    %139 = vector.broadcast %cst_51 : f32 to vector<8x32xf32>
    %140 = arith.addf %139, %138 : vector<8x32xf32>
    %141 = arith.divf %139, %140 : vector<8x32xf32>
    %142 = vector.extract_strided_slice %129 {offsets = [0, 64], sizes = [8, 32], strides = [1, 1]} : vector<8x128xf32> to vector<8x32xf32>
    %143 = math.tanh %142 : vector<8x32xf32>
    %144 = vector.extract_strided_slice %129 {offsets = [0, 96], sizes = [8, 32], strides = [1, 1]} : vector<8x128xf32> to vector<8x32xf32>
    %145 = arith.negf %144 : vector<8x32xf32>
    %146 = math.exp %145 : vector<8x32xf32>
    %cst_52 = arith.constant 1.000000e+00 : f32
    %147 = vector.broadcast %cst_52 : f32 to vector<8x32xf32>
    %148 = arith.addf %147, %146 : vector<8x32xf32>
    %149 = arith.divf %147, %148 : vector<8x32xf32>
    %150 = arith.mulf %141, %120 : vector<8x32xf32>
    %151 = arith.mulf %135, %143 : vector<8x32xf32>
    %152 = arith.addf %150, %151 : vector<8x32xf32>
    %153 = math.tanh %152 : vector<8x32xf32>
    %154 = arith.mulf %149, %153 : vector<8x32xf32>
    %c24_53 = arith.constant 24 : index
    %c0_54 = arith.constant 0 : index
    %155 = vector.load %arg1[%c24_53, %c0_54] : memref<64x32xf32, #tpu.memory_space<vmem>>, vector<8x32xf32>
    %cst_55 = arith.constant 0.000000e+00 : f32
    %156 = vector.broadcast %cst_55 : f32 to vector<8x32xf32>
    %157 = arith.cmpf one, %155, %156 : vector<8x32xf32>
    %158 = arith.select %157, %154, %119 : vector<8x32xi1>, vector<8x32xf32>
    %159 = arith.select %157, %152, %120 : vector<8x32xi1>, vector<8x32xf32>
    %cst_56 = arith.constant 0.000000e+00 : f32
    %160 = vector.broadcast %cst_56 : f32 to vector<8x32xf32>
    %161 = arith.select %157, %154, %160 : vector<8x32xi1>, vector<8x32xf32>
    %162 = vector.extract_strided_slice %161 {offsets = [0, 0], sizes = [8, 16], strides = [1, 1]} : vector<8x32xf32> to vector<8x16xf32>
    %c24_57 = arith.constant 24 : index
    %c0_58 = arith.constant 0 : index
    %163 = vector.load %arg10[%c24_57, %c0_58] : memref<64x16xf32, #tpu.memory_space<vmem>>, vector<8x16xf32>
    tpu.vector_store %arg10[%c24_57, %c0_58], %162 {strides = array<i32>} : memref<64x16xf32, #tpu.memory_space<vmem>>, vector<8x16xf32>,
    %164 = vector.extract_strided_slice %161 {offsets = [0, 16], sizes = [8, 16], strides = [1, 1]} : vector<8x32xf32> to vector<8x16xf32>
    %c32 = arith.constant 32 : index
    %c0_59 = arith.constant 0 : index
    %165 = vector.load %arg11[%c32, %c0_59] : memref<64x16xf32, #tpu.memory_space<vmem>>, vector<8x16xf32>
    tpu.vector_store %arg11[%c32, %c0_59], %164 {strides = array<i32>} : memref<64x16xf32, #tpu.memory_space<vmem>>, vector<8x16xf32>,
    %c32_60 = arith.constant 32 : index
    %c0_61 = arith.constant 0 : index
    %166 = vector.load %arg9[%c32_60, %c0_61] : memref<64x128xf32, #tpu.memory_space<vmem>>, vector<8x128xf32>
    %cst_62 = arith.constant dense<0.000000e+00> : vector<8x128xf32>
    %167 = tpu.matmul %158, %7, %cst_62 {dimension_numbers = #tpu.dot_dimension_numbers<[1], [0], [0], [1], [0, 0, 1, 1], [], []>} : vector<8x32xf32>, vector<32x128xf32>, vector<8x128xf32> -> vector<8x128xf32>
    %168 = arith.addf %166, %167 : vector<8x128xf32>
    %169 = vector.extract_strided_slice %168 {offsets = [0, 0], sizes = [8, 32], strides = [1, 1]} : vector<8x128xf32> to vector<8x32xf32>
    %170 = arith.negf %169 : vector<8x32xf32>
    %171 = math.exp %170 : vector<8x32xf32>
    %cst_63 = arith.constant 1.000000e+00 : f32
    %172 = vector.broadcast %cst_63 : f32 to vector<8x32xf32>
    %173 = arith.addf %172, %171 : vector<8x32xf32>
    %174 = arith.divf %172, %173 : vector<8x32xf32>
    %175 = vector.extract_strided_slice %168 {offsets = [0, 32], sizes = [8, 32], strides = [1, 1]} : vector<8x128xf32> to vector<8x32xf32>
    %176 = arith.negf %175 : vector<8x32xf32>
    %177 = math.exp %176 : vector<8x32xf32>
    %cst_64 = arith.constant 1.000000e+00 : f32
    %178 = vector.broadcast %cst_64 : f32 to vector<8x32xf32>
    %179 = arith.addf %178, %177 : vector<8x32xf32>
    %180 = arith.divf %178, %179 : vector<8x32xf32>
    %181 = vector.extract_strided_slice %168 {offsets = [0, 64], sizes = [8, 32], strides = [1, 1]} : vector<8x128xf32> to vector<8x32xf32>
    %182 = math.tanh %181 : vector<8x32xf32>
    %183 = vector.extract_strided_slice %168 {offsets = [0, 96], sizes = [8, 32], strides = [1, 1]} : vector<8x128xf32> to vector<8x32xf32>
    %184 = arith.negf %183 : vector<8x32xf32>
    %185 = math.exp %184 : vector<8x32xf32>
    %cst_65 = arith.constant 1.000000e+00 : f32
    %186 = vector.broadcast %cst_65 : f32 to vector<8x32xf32>
    %187 = arith.addf %186, %185 : vector<8x32xf32>
    %188 = arith.divf %186, %187 : vector<8x32xf32>
    %189 = arith.mulf %180, %159 : vector<8x32xf32>
    %190 = arith.mulf %174, %182 : vector<8x32xf32>
    %191 = arith.addf %189, %190 : vector<8x32xf32>
    %192 = math.tanh %191 : vector<8x32xf32>
    %193 = arith.mulf %188, %192 : vector<8x32xf32>
    %c32_66 = arith.constant 32 : index
    %c0_67 = arith.constant 0 : index
    %194 = vector.load %arg1[%c32_66, %c0_67] : memref<64x32xf32, #tpu.memory_space<vmem>>, vector<8x32xf32>
    %cst_68 = arith.constant 0.000000e+00 : f32
    %195 = vector.broadcast %cst_68 : f32 to vector<8x32xf32>
    %196 = arith.cmpf one, %194, %195 : vector<8x32xf32>
    %197 = arith.select %196, %193, %158 : vector<8x32xi1>, vector<8x32xf32>
    %198 = arith.select %196, %191, %159 : vector<8x32xi1>, vector<8x32xf32>
    %cst_69 = arith.constant 0.000000e+00 : f32
    %199 = vector.broadcast %cst_69 : f32 to vector<8x32xf32>
    %200 = arith.select %196, %193, %199 : vector<8x32xi1>, vector<8x32xf32>
    %201 = vector.extract_strided_slice %200 {offsets = [0, 0], sizes = [8, 16], strides = [1, 1]} : vector<8x32xf32> to vector<8x16xf32>
    %c32_70 = arith.constant 32 : index
    %c0_71 = arith.constant 0 : index
    %202 = vector.load %arg10[%c32_70, %c0_71] : memref<64x16xf32, #tpu.memory_space<vmem>>, vector<8x16xf32>
    tpu.vector_store %arg10[%c32_70, %c0_71], %201 {strides = array<i32>} : memref<64x16xf32, #tpu.memory_space<vmem>>, vector<8x16xf32>,
    %203 = vector.extract_strided_slice %200 {offsets = [0, 16], sizes = [8, 16], strides = [1, 1]} : vector<8x32xf32> to vector<8x16xf32>
    %c24_72 = arith.constant 24 : index
    %c0_73 = arith.constant 0 : index
    %204 = vector.load %arg11[%c24_72, %c0_73] : memref<64x16xf32, #tpu.memory_space<vmem>>, vector<8x16xf32>
    tpu.vector_store %arg11[%c24_72, %c0_73], %203 {strides = array<i32>} : memref<64x16xf32, #tpu.memory_space<vmem>>, vector<8x16xf32>,
    %c40_74 = arith.constant 40 : index
    %c0_75 = arith.constant 0 : index
    %205 = vector.load %arg9[%c40_74, %c0_75] : memref<64x128xf32, #tpu.memory_space<vmem>>, vector<8x128xf32>
    %cst_76 = arith.constant dense<0.000000e+00> : vector<8x128xf32>
    %206 = tpu.matmul %197, %7, %cst_76 {dimension_numbers = #tpu.dot_dimension_numbers<[1], [0], [0], [1], [0, 0, 1, 1], [], []>} : vector<8x32xf32>, vector<32x128xf32>, vector<8x128xf32> -> vector<8x128xf32>
    %207 = arith.addf %205, %206 : vector<8x128xf32>
    %208 = vector.extract_strided_slice %207 {offsets = [0, 0], sizes = [8, 32], strides = [1, 1]} : vector<8x128xf32> to vector<8x32xf32>
    %209 = arith.negf %208 : vector<8x32xf32>
    %210 = math.exp %209 : vector<8x32xf32>
    %cst_77 = arith.constant 1.000000e+00 : f32
    %211 = vector.broadcast %cst_77 : f32 to vector<8x32xf32>
    %212 = arith.addf %211, %210 : vector<8x32xf32>
    %213 = arith.divf %211, %212 : vector<8x32xf32>
    %214 = vector.extract_strided_slice %207 {offsets = [0, 32], sizes = [8, 32], strides = [1, 1]} : vector<8x128xf32> to vector<8x32xf32>
    %215 = arith.negf %214 : vector<8x32xf32>
    %216 = math.exp %215 : vector<8x32xf32>
    %cst_78 = arith.constant 1.000000e+00 : f32
    %217 = vector.broadcast %cst_78 : f32 to vector<8x32xf32>
    %218 = arith.addf %217, %216 : vector<8x32xf32>
    %219 = arith.divf %217, %218 : vector<8x32xf32>
    %220 = vector.extract_strided_slice %207 {offsets = [0, 64], sizes = [8, 32], strides = [1, 1]} : vector<8x128xf32> to vector<8x32xf32>
    %221 = math.tanh %220 : vector<8x32xf32>
    %222 = vector.extract_strided_slice %207 {offsets = [0, 96], sizes = [8, 32], strides = [1, 1]} : vector<8x128xf32> to vector<8x32xf32>
    %223 = arith.negf %222 : vector<8x32xf32>
    %224 = math.exp %223 : vector<8x32xf32>
    %cst_79 = arith.constant 1.000000e+00 : f32
    %225 = vector.broadcast %cst_79 : f32 to vector<8x32xf32>
    %226 = arith.addf %225, %224 : vector<8x32xf32>
    %227 = arith.divf %225, %226 : vector<8x32xf32>
    %228 = arith.mulf %219, %198 : vector<8x32xf32>
    %229 = arith.mulf %213, %221 : vector<8x32xf32>
    %230 = arith.addf %228, %229 : vector<8x32xf32>
    %231 = math.tanh %230 : vector<8x32xf32>
    %232 = arith.mulf %227, %231 : vector<8x32xf32>
    %c40_80 = arith.constant 40 : index
    %c0_81 = arith.constant 0 : index
    %233 = vector.load %arg1[%c40_80, %c0_81] : memref<64x32xf32, #tpu.memory_space<vmem>>, vector<8x32xf32>
    %cst_82 = arith.constant 0.000000e+00 : f32
    %234 = vector.broadcast %cst_82 : f32 to vector<8x32xf32>
    %235 = arith.cmpf one, %233, %234 : vector<8x32xf32>
    %236 = arith.select %235, %232, %197 : vector<8x32xi1>, vector<8x32xf32>
    %237 = arith.select %235, %230, %198 : vector<8x32xi1>, vector<8x32xf32>
    %cst_83 = arith.constant 0.000000e+00 : f32
    %238 = vector.broadcast %cst_83 : f32 to vector<8x32xf32>
    %239 = arith.select %235, %232, %238 : vector<8x32xi1>, vector<8x32xf32>
    %240 = vector.extract_strided_slice %239 {offsets = [0, 0], sizes = [8, 16], strides = [1, 1]} : vector<8x32xf32> to vector<8x16xf32>
    %c40_84 = arith.constant 40 : index
    %c0_85 = arith.constant 0 : index
    %241 = vector.load %arg10[%c40_84, %c0_85] : memref<64x16xf32, #tpu.memory_space<vmem>>, vector<8x16xf32>
    tpu.vector_store %arg10[%c40_84, %c0_85], %240 {strides = array<i32>} : memref<64x16xf32, #tpu.memory_space<vmem>>, vector<8x16xf32>,
    %242 = vector.extract_strided_slice %239 {offsets = [0, 16], sizes = [8, 16], strides = [1, 1]} : vector<8x32xf32> to vector<8x16xf32>
    %c16_86 = arith.constant 16 : index
    %c0_87 = arith.constant 0 : index
    %243 = vector.load %arg11[%c16_86, %c0_87] : memref<64x16xf32, #tpu.memory_space<vmem>>, vector<8x16xf32>
    tpu.vector_store %arg11[%c16_86, %c0_87], %242 {strides = array<i32>} : memref<64x16xf32, #tpu.memory_space<vmem>>, vector<8x16xf32>,
    %c48_88 = arith.constant 48 : index
    %c0_89 = arith.constant 0 : index
    %244 = vector.load %arg9[%c48_88, %c0_89] : memref<64x128xf32, #tpu.memory_space<vmem>>, vector<8x128xf32>
    %cst_90 = arith.constant dense<0.000000e+00> : vector<8x128xf32>
    %245 = tpu.matmul %236, %7, %cst_90 {dimension_numbers = #tpu.dot_dimension_numbers<[1], [0], [0], [1], [0, 0, 1, 1], [], []>} : vector<8x32xf32>, vector<32x128xf32>, vector<8x128xf32> -> vector<8x128xf32>
    %246 = arith.addf %244, %245 : vector<8x128xf32>
    %247 = vector.extract_strided_slice %246 {offsets = [0, 0], sizes = [8, 32], strides = [1, 1]} : vector<8x128xf32> to vector<8x32xf32>
    %248 = arith.negf %247 : vector<8x32xf32>
    %249 = math.exp %248 : vector<8x32xf32>
    %cst_91 = arith.constant 1.000000e+00 : f32
    %250 = vector.broadcast %cst_91 : f32 to vector<8x32xf32>
    %251 = arith.addf %250, %249 : vector<8x32xf32>
    %252 = arith.divf %250, %251 : vector<8x32xf32>
    %253 = vector.extract_strided_slice %246 {offsets = [0, 32], sizes = [8, 32], strides = [1, 1]} : vector<8x128xf32> to vector<8x32xf32>
    %254 = arith.negf %253 : vector<8x32xf32>
    %255 = math.exp %254 : vector<8x32xf32>
    %cst_92 = arith.constant 1.000000e+00 : f32
    %256 = vector.broadcast %cst_92 : f32 to vector<8x32xf32>
    %257 = arith.addf %256, %255 : vector<8x32xf32>
    %258 = arith.divf %256, %257 : vector<8x32xf32>
    %259 = vector.extract_strided_slice %246 {offsets = [0, 64], sizes = [8, 32], strides = [1, 1]} : vector<8x128xf32> to vector<8x32xf32>
    %260 = math.tanh %259 : vector<8x32xf32>
    %261 = vector.extract_strided_slice %246 {offsets = [0, 96], sizes = [8, 32], strides = [1, 1]} : vector<8x128xf32> to vector<8x32xf32>
    %262 = arith.negf %261 : vector<8x32xf32>
    %263 = math.exp %262 : vector<8x32xf32>
    %cst_93 = arith.constant 1.000000e+00 : f32
    %264 = vector.broadcast %cst_93 : f32 to vector<8x32xf32>
    %265 = arith.addf %264, %263 : vector<8x32xf32>
    %266 = arith.divf %264, %265 : vector<8x32xf32>
    %267 = arith.mulf %258, %237 : vector<8x32xf32>
    %268 = arith.mulf %252, %260 : vector<8x32xf32>
    %269 = arith.addf %267, %268 : vector<8x32xf32>
    %270 = math.tanh %269 : vector<8x32xf32>
    %271 = arith.mulf %266, %270 : vector<8x32xf32>
    %c48_94 = arith.constant 48 : index
    %c0_95 = arith.constant 0 : index
    %272 = vector.load %arg1[%c48_94, %c0_95] : memref<64x32xf32, #tpu.memory_space<vmem>>, vector<8x32xf32>
    %cst_96 = arith.constant 0.000000e+00 : f32
    %273 = vector.broadcast %cst_96 : f32 to vector<8x32xf32>
    %274 = arith.cmpf one, %272, %273 : vector<8x32xf32>
    %275 = arith.select %274, %271, %236 : vector<8x32xi1>, vector<8x32xf32>
    %276 = arith.select %274, %269, %237 : vector<8x32xi1>, vector<8x32xf32>
    %cst_97 = arith.constant 0.000000e+00 : f32
    %277 = vector.broadcast %cst_97 : f32 to vector<8x32xf32>
    %278 = arith.select %274, %271, %277 : vector<8x32xi1>, vector<8x32xf32>
    %279 = vector.extract_strided_slice %278 {offsets = [0, 0], sizes = [8, 16], strides = [1, 1]} : vector<8x32xf32> to vector<8x16xf32>
    %c48_98 = arith.constant 48 : index
    %c0_99 = arith.constant 0 : index
    %280 = vector.load %arg10[%c48_98, %c0_99] : memref<64x16xf32, #tpu.memory_space<vmem>>, vector<8x16xf32>
    tpu.vector_store %arg10[%c48_98, %c0_99], %279 {strides = array<i32>} : memref<64x16xf32, #tpu.memory_space<vmem>>, vector<8x16xf32>,
    %281 = vector.extract_strided_slice %278 {offsets = [0, 16], sizes = [8, 16], strides = [1, 1]} : vector<8x32xf32> to vector<8x16xf32>
    %c8_100 = arith.constant 8 : index
    %c0_101 = arith.constant 0 : index
    %282 = vector.load %arg11[%c8_100, %c0_101] : memref<64x16xf32, #tpu.memory_space<vmem>>, vector<8x16xf32>
    tpu.vector_store %arg11[%c8_100, %c0_101], %281 {strides = array<i32>} : memref<64x16xf32, #tpu.memory_space<vmem>>, vector<8x16xf32>,
    %c56_102 = arith.constant 56 : index
    %c0_103 = arith.constant 0 : index
    %283 = vector.load %arg9[%c56_102, %c0_103] : memref<64x128xf32, #tpu.memory_space<vmem>>, vector<8x128xf32>
    %cst_104 = arith.constant dense<0.000000e+00> : vector<8x128xf32>
    %284 = tpu.matmul %275, %7, %cst_104 {dimension_numbers = #tpu.dot_dimension_numbers<[1], [0], [0], [1], [0, 0, 1, 1], [], []>} : vector<8x32xf32>, vector<32x128xf32>, vector<8x128xf32> -> vector<8x128xf32>
    %285 = arith.addf %283, %284 : vector<8x128xf32>
    %286 = vector.extract_strided_slice %285 {offsets = [0, 0], sizes = [8, 32], strides = [1, 1]} : vector<8x128xf32> to vector<8x32xf32>
    %287 = arith.negf %286 : vector<8x32xf32>
    %288 = math.exp %287 : vector<8x32xf32>
    %cst_105 = arith.constant 1.000000e+00 : f32
    %289 = vector.broadcast %cst_105 : f32 to vector<8x32xf32>
    %290 = arith.addf %289, %288 : vector<8x32xf32>
    %291 = arith.divf %289, %290 : vector<8x32xf32>
    %292 = vector.extract_strided_slice %285 {offsets = [0, 32], sizes = [8, 32], strides = [1, 1]} : vector<8x128xf32> to vector<8x32xf32>
    %293 = arith.negf %292 : vector<8x32xf32>
    %294 = math.exp %293 : vector<8x32xf32>
    %cst_106 = arith.constant 1.000000e+00 : f32
    %295 = vector.broadcast %cst_106 : f32 to vector<8x32xf32>
    %296 = arith.addf %295, %294 : vector<8x32xf32>
    %297 = arith.divf %295, %296 : vector<8x32xf32>
    %298 = vector.extract_strided_slice %285 {offsets = [0, 64], sizes = [8, 32], strides = [1, 1]} : vector<8x128xf32> to vector<8x32xf32>
    %299 = math.tanh %298 : vector<8x32xf32>
    %300 = vector.extract_strided_slice %285 {offsets = [0, 96], sizes = [8, 32], strides = [1, 1]} : vector<8x128xf32> to vector<8x32xf32>
    %301 = arith.negf %300 : vector<8x32xf32>
    %302 = math.exp %301 : vector<8x32xf32>
    %cst_107 = arith.constant 1.000000e+00 : f32
    %303 = vector.broadcast %cst_107 : f32 to vector<8x32xf32>
    %304 = arith.addf %303, %302 : vector<8x32xf32>
    %305 = arith.divf %303, %304 : vector<8x32xf32>
    %306 = arith.mulf %297, %276 : vector<8x32xf32>
    %307 = arith.mulf %291, %299 : vector<8x32xf32>
    %308 = arith.addf %306, %307 : vector<8x32xf32>
    %309 = math.tanh %308 : vector<8x32xf32>
    %310 = arith.mulf %305, %309 : vector<8x32xf32>
    %c56_108 = arith.constant 56 : index
    %c0_109 = arith.constant 0 : index
    %311 = vector.load %arg1[%c56_108, %c0_109] : memref<64x32xf32, #tpu.memory_space<vmem>>, vector<8x32xf32>
    %cst_110 = arith.constant 0.000000e+00 : f32
    %312 = vector.broadcast %cst_110 : f32 to vector<8x32xf32>
    %313 = arith.cmpf one, %311, %312 : vector<8x32xf32>
    %cst_111 = arith.constant 0.000000e+00 : f32
    %314 = vector.broadcast %cst_111 : f32 to vector<8x32xf32>
    %315 = arith.select %313, %310, %314 : vector<8x32xi1>, vector<8x32xf32>
    %316 = vector.extract_strided_slice %315 {offsets = [0, 0], sizes = [8, 16], strides = [1, 1]} : vector<8x32xf32> to vector<8x16xf32>
    %c56_112 = arith.constant 56 : index
    %c0_113 = arith.constant 0 : index
    %317 = vector.load %arg10[%c56_112, %c0_113] : memref<64x16xf32, #tpu.memory_space<vmem>>, vector<8x16xf32>
    tpu.vector_store %arg10[%c56_112, %c0_113], %316 {strides = array<i32>} : memref<64x16xf32, #tpu.memory_space<vmem>>, vector<8x16xf32>,
    %318 = vector.extract_strided_slice %315 {offsets = [0, 16], sizes = [8, 16], strides = [1, 1]} : vector<8x32xf32> to vector<8x16xf32>
    %c0_114 = arith.constant 0 : index
    %c0_115 = arith.constant 0 : index
    %319 = vector.load %arg11[%c0_114, %c0_115] : memref<64x16xf32, #tpu.memory_space<vmem>>, vector<8x16xf32>
    tpu.vector_store %arg11[%c0_114, %c0_115], %318 {strides = array<i32>} : memref<64x16xf32, #tpu.memory_space<vmem>>, vector<8x16xf32>,
    %c0_116 = arith.constant 0 : index
    %c0_117 = arith.constant 0 : index
    %320 = vector.load %arg10[%c0_116, %c0_117] : memref<64x16xf32, #tpu.memory_space<vmem>>, vector<64x16xf32>
    %c0_118 = arith.constant 0 : index
    %c0_119 = arith.constant 0 : index
    %321 = vector.load %arg5[%c0_118, %c0_119] : memref<16x128xf32, #tpu.memory_space<vmem>>, vector<16x128xf32>
    %cst_120 = arith.constant dense<0.000000e+00> : vector<64x128xf32>
    %322 = tpu.matmul %320, %321, %cst_120 {dimension_numbers = #tpu.dot_dimension_numbers<[1], [0], [0], [1], [0, 0, 1, 1], [], []>} : vector<64x16xf32>, vector<16x128xf32>, vector<64x128xf32> -> vector<64x128xf32>
    %c0_121 = arith.constant 0 : index
    %c0_122 = arith.constant 0 : index
    %323 = vector.load %arg11[%c0_121, %c0_122] : memref<64x16xf32, #tpu.memory_space<vmem>>, vector<64x16xf32>
    %c0_123 = arith.constant 0 : index
    %c0_124 = arith.constant 0 : index
    %324 = vector.load %arg6[%c0_123, %c0_124] : memref<16x128xf32, #tpu.memory_space<vmem>>, vector<16x128xf32>
    %cst_125 = arith.constant dense<0.000000e+00> : vector<64x128xf32>
    %325 = tpu.matmul %323, %324, %cst_125 {dimension_numbers = #tpu.dot_dimension_numbers<[1], [0], [0], [1], [0, 0, 1, 1], [], []>} : vector<64x16xf32>, vector<16x128xf32>, vector<64x128xf32> -> vector<64x128xf32>
    %326 = arith.addf %322, %325 : vector<64x128xf32>
    %c0_126 = arith.constant 0 : index
    %c0_127 = arith.constant 0 : index
    %327 = vector.load %arg7[%c0_126, %c0_127] : memref<1x128xf32, #tpu.memory_space<vmem>>, vector<1x128xf32>
    %328 = vector.broadcast %327 : vector<1x128xf32> to vector<64x128xf32>
    %329 = arith.addf %326, %328 : vector<64x128xf32>
    %c0_128 = arith.constant 0 : index
    %c0_129 = arith.constant 0 : index
    %330 = vector.load %arg8[%c0_128, %c0_129] : memref<64x128xf32, #tpu.memory_space<vmem>>, vector<64x128xf32>
    tpu.vector_store %arg8[%c0_128, %c0_129], %329 {strides = array<i32>} : memref<64x128xf32, #tpu.memory_space<vmem>>, vector<64x128xf32>,
    return
  }
}

</mosaic_0001>

<bundles_post_ra>
// kernel: birnn_forward.1
= control target key start
LH: loop header
LB: loop body
LE: loop exit
PB: predicated region body
PF: predicated region fallthrough
CT: control target
= control target key end

     0   :  { %v1083_v11 = vmov 0.0   ;;  %vm49_vm0 = vcmask 523264   ;;  %s1084_s9 = smov 64   ;;  %s1086_s10 = smov 96   ;;  %vm202_vm6 = vcmask 130048   ;;  %vm128_vm7 = vcmask 261120   ;;  %s1436_s2 = inlined_call_operand.vmem [shape: f32[64,128], index: 2, kind: input, shape index: {}]   ;;  %s1437_s4 = inlined_call_operand.vmem [shape: f32[32,128], index: 4, kind: input, shape index: {}]   ;;  %s1438_s3 = inlined_call_operand.vmem [shape: f32[1,128], index: 3, kind: input, shape index: {}]   ;;  %s1439_s0 = inlined_call_operand.vmem [shape: f32[64,64], index: 0, kind: input, shape index: {}]   ;;  %s1440_s1 = inlined_call_operand.vmem [shape: f32[64,32], index: 1, kind: input, shape index: {}]   ;;  %s1441_s5 = inlined_call_operand.vmem [shape: f32[16,128], index: 5, kind: input, shape index: {}]   ;;  %s1442_s7 = inlined_call_operand.vmem [shape: f32[1,128], index: 7, kind: input, shape index: {}]   ;;  %s1443_s6 = inlined_call_operand.vmem [shape: f32[16,128], index: 6, kind: input, shape index: {}]   ;;  %s1444_s8 = inlined_call_operand.vmem [shape: f32[64,128], index: 8, kind: output, shape index: {}]  }
   0x1   :  { %v44_v0 = vld [vmem:[%s1436_s2 + $0x38] sm:$0xff]  ;;  %v43_v1 = vld [vmem:[%s1436_s2 + $0x30] sm:$0xff]  ;;  %v42_v2 = vld [vmem:[%s1436_s2 + $0x28] sm:$0xff] }
   0x2   :  { %82 = vmatpush.msra.mxu0 %v44_v0  ;;  %v1145_v3 = vld [vmem:[%s1437_s4 + $0x18] sm:$0xff]  ;;  %v1150_v4 = vld [vmem:[%s1437_s4 + $0x10] sm:$0xff]  ;;  %v41_v5 = vld [vmem:[%s1436_s2 + $0x20] sm:$0xff] }
   0x3   :  { %144 = vmatpush.msra.mxu1 %v1145_v3  ;;  %v1159_v6 = vld [vmem:[%s1437_s4 + $0x8] sm:$0xff]  ;;  %224 = vmatpush.msra.mxu2 %v1145_v3  ;;  %v40_v7 = vld [vmem:[%s1436_s2 + $0x18] sm:$0xff]  ;;  %v1170_v8 = vld [vmem:[%s1437_s4] sm:$0xff] }
   0x4   :  { %83 = vmatpush.msra.mxu0 %v43_v1  ;;  %564 = vmatpush.msra.mxu3 %v1145_v3  ;;  %v39_v9 = vld [vmem:[%s1436_s2 + $0x10] sm:$0xff]  ;;  %v38_v10 = vld [vmem:[%s1436_s2 + $0x8] sm:$0xff]  ;;  %v37_v12 = vld [vmem:[%s1436_s2] sm:$0xff] }
   0x5   :  { %145 = vmatpush.msra.mxu1 %v1150_v4  ;;  %225 = vmatpush.msra.mxu2 %v1150_v4  ;;  %v29_v13 = vld [vmem:[%s1439_s0] sm:$0xff]  ;;  %v30_v44 = vld [vmem:[%s1439_s0 + $0x8] sm:$0xff] }
   0x6   :  { %84 = vmatpush.msra.mxu0 %v42_v2  ;;  %565 = vmatpush.msra.mxu3 %v1150_v4  ;;  %v1208_v14 = vld [vmem:[%s1438_s3] ss:$0 sm:$0xff]  ;;  %s1085_s3 = smov 32  }
   0x7   :  { %146 = vmatpush.msra.mxu1 %v1159_v6  ;;  %226 = vmatpush.msra.mxu2 %v1159_v6  ;;  %v190_v39 = vld [vmem:[%s1440_s1] sm:$0xff] }
   0x8   :  { %85 = vmatpush.msra.mxu0 %v41_v5  ;;  %566 = vmatpush.msra.mxu3 %v1159_v6  ;;  %vm191_vm5 = vcmp.ne.f32.partialorder %v190_v39, 0.0 }
   0x9   :  { %147 = vmatpush.msra.mxu1 %v1170_v8  ;;  %227 = vmatpush.msra.mxu2 %v1170_v8 }
   0xa   :  { %86 = vmatpush.msra.mxu0 %v40_v7  ;;  %148 = vmatmul.f32.vlgmr.msra.gmra.mxu1 %v1083_v11 }
   0xb   :  { %309 = vmatpush.msrb.mxu2 %v1145_v3  ;;  %394 = vmatpush.msrb.mxu1 %v1145_v3 }
   0xc   :  { %87 = vmatpush.msra.mxu0 %v39_v9  ;;  %567 = vmatpush.msra.mxu3 %v1170_v8 }
   0xd   :  { %310 = vmatpush.msrb.mxu2 %v1150_v4  ;;  %395 = vmatpush.msrb.mxu1 %v1150_v4 }
   0xe   :  { %88 = vmatpush.msra.mxu0 %v38_v10 }
   0xf   :  { %311 = vmatpush.msrb.mxu2 %v1159_v6  ;;  %396 = vmatpush.msrb.mxu1 %v1159_v6 }
  0x10   :  { %89 = vmatpush.msra.mxu0 %v37_v12 }
  0x11   :  { %971 = vmatmul.msk.f32.vlgmr.msra.gmra.mxu0 %vm49_vm0, %v29_v13  ;;  %312 = vmatpush.msrb.mxu2 %v1170_v8 }
  0x12   :  { %397 = vmatpush.msrb.mxu1 %v1170_v8 }
  0x14   :  { %649 = vmatpush.msra.mxu1 %v1145_v3 }
  0x16   :  { %650 = vmatpush.msra.mxu1 %v1150_v4 }
  0x18   :  { %651 = vmatpush.msra.mxu1 %v1159_v6 }
  0x19   :  { %972 = vmatmul.msk.f32.gmra.mxu0 %vm49_vm0, %v30_v44 }
  0x1a   :  { %652 = vmatpush.msra.mxu1 %v1170_v8 }
  0x87   :  { %v149_v16 = vpop.f32.mrf.mxu1 }
  0x8e   :  { %v91_v15 = vpop.f32.mrf.mxu0 }
  0x8f   :  { %v92_v17 = vadd.f32 %v1208_v14, %v91_v15  ;;  %v274_v15 = vld [vmem:[%s1440_s1 + $0x8] sm:$0xff] }
  0x90   :  { %vm275_vm12 = vcmp.ne.f32.partialorder %v274_v15, 0.0 }
  0x91   :  { %v152_v18 = vadd.f32 %v149_v16, %v92_v17 }
  0x93   :  { %1019 = vtanh.f32 %v152_v18  ;;  %v979_v20 = vmul.f32 -1.442695, %v152_v18  ;;  %v31_v18 = vld [vmem:[%s1439_s0 + $0x10] sm:$0xff] }
  0x94   :  { %973 = vmatmul.msk.f32.gmra.mxu0 %vm49_vm0, %v31_v18 }
  0x95   :  { %1021 = vpow2.f32 %v979_v20 }
  0x96   :  { %v94_v47 = vpop.f32.mrf.mxu0 }
  0x97   :  { %v95_v48 = vadd.f32 %v1208_v14, %v94_v47  ;;  %v359_v47 = vld [vmem:[%s1440_s1 + $0x10] sm:$0xff] }
  0x99   :  { %v1020_v19 = vpop.eup %1019 }
  0x9a   :  { %175 = vrot.lane.b32.xlu0 %v1020_v19, %s1084_s9 }
  0x9b   :  { %v1022_v21 = vpop.eup %1021 }
  0x9c   :  { %v156_v22 = vadd.f32 1.0, %v1022_v21 }
  0x9e   :  { %1023 = vrcp.f32 %v156_v22  ;;  %v168_v28 = vand.u32 2147483648, %v156_v22  ;;  %vm162_vm2 = vweird.f32 %v156_v22  ;;  %v166_v29 = vand.u32 2147483647, %v156_v22 }
  0xa0   :  { %v169_v31 = vor.u32 1.1754944e-38, %v168_v28  ;;  %vm167_vm4 = vcmp.eq.f32.partialorder %v166_v29, 8.507059e+37 }
  0xa4   :  { %v1024_v23 = vpop.eup %1023 }
  0xa5   :  { %v158_v24 = vmul.f32 %v1024_v23, %v156_v22  ;;  %vm163_vm1 = vweird.f32 %v1024_v23 }
  0xa6   :  { %vm164_vm3 = vmor %vm162_vm2, %vm163_vm1  ;;  %vm360_vm2 = vcmp.ne.f32.partialorder %v359_v47, 0.0 }
  0xa7   :  { %v159_v25 = vsub.f32 1.0, %v158_v24 }
  0xa9   :  { %v160_v26 = vmul.f32 %v1024_v23, %v159_v25 }
  0xab   :  { %v161_v27 = vadd.f32 %v1024_v23, %v160_v26 }
  0xad   :  { %v165_v30 = vsel %vm164_vm3, %v1024_v23, %v161_v27 }
  0xae   :  { %v170_v33 = vsel %vm167_vm4, %v169_v31, %v165_v30 }
  0xaf   :  { %v173_v35 = vmul.f32 0.0, %v170_v33 }
 0x10c   :  { %v176_v32 = vpop.permute.xlu0 %175 }
 0x10d   :  { %v178_v34 = vmul.f32 %v176_v32, %v170_v33 }
 0x10f   :  { %180 = vrot.lane.b32.xlu0 %v178_v34, %s1085_s3 }
 0x111   :  { %v97_v22 = vpop.f32.mrf.mxu0 }
 0x112   :  { %v98_v23 = vadd.f32 %v1208_v14, %v97_v22  ;;  %v444_v22 = vld [vmem:[%s1440_s1 + $0x18] sm:$0xff] }
 0x181   :  { %v181_v36 = vpop.permute.xlu0 %180 }
 0x182   :  { %v183_v37 = vadd.f32 %v181_v36, %v173_v35 }
 0x184   :  { %1025 = vtanh.f32 %v183_v37  ;;  %198 = vrot.lane.b32.xlu2 %v183_v37, %s1086_s10 }
 0x18a   :  { %v1026_v38 = vpop.eup %1025 }
 0x18b   :  { %186 = vrot.lane.b32.xlu1 %v1026_v38, %s1084_s9 }
 0x1de   :  { %v199_v40 = vpop.permute.xlu2 %198 }
 0x1df   :  { %v201_v41 = vsel %vm191_vm5, %v199_v40, 0.0 }
 0x1e0   :  { %254 = vrot.lane.b32.xlu0 %v201_v41, %s1085_s3 }
 0x1fd   :  { %v187_v42 = vpop.permute.xlu1 %186 }
 0x1fe   :  { %v189_v43 = vmul.f32 %v187_v42, %v170_v33 }
 0x200   :  { %193 = vrot.lane.b32.xlu1 %v189_v43, %s1085_s3  ;;  %v32_v43 = vld [vmem:[%s1439_s0 + $0x18] sm:$0xff] }
 0x201   :  { %974 = vmatmul.msk.f32.gmra.mxu0 %vm49_vm0, %v32_v43 }
 0x252   :  { %v255_v5 = vpop.permute.xlu0 %254 }
 0x272   :  { %v194_v45 = vpop.permute.xlu1 %193 }
 0x273   :  { %v1224_v46 = vsel %vm191_vm5, %v194_v45, 0.0 }
 0x274   :  { %203 = vst.msk [vmem:[#allocation3] sm:$0xff] %vm202_vm6, %v1224_v46  ;;  %980 = vmatmul.msk.f32.vlgmr.msra.gmra.mxu2 %vm128_vm7, %v1224_v46 }
 0x275   :  { %479 = vmatpush.msra.mxu2 %v1145_v3 }
 0x277   :  { %480 = vmatpush.msra.mxu2 %v1150_v4 }
 0x279   :  { %481 = vmatpush.msra.mxu2 %v1159_v6 }
 0x27b   :  { %482 = vmatpush.msra.mxu2 %v1170_v8 }
 0x2f7   :  { %v229_v49 = vpop.f32.mrf.mxu2 }
 0x2f8   :  { %v232_v50 = vadd.f32 %v229_v49, %v95_v48 }
 0x2fa   :  { %1027 = vtanh.f32 %v232_v50  ;;  %v981_v52 = vmul.f32 -1.442695, %v232_v50 }
 0x2fc   :  { %1029 = vpow2.f32 %v981_v52 }
 0x300   :  { %v1028_v51 = vpop.eup %1027 }
 0x301   :  { %259 = vrot.lane.b32.xlu2 %v1028_v51, %s1084_s9 }
 0x302   :  { %v1030_v53 = vpop.eup %1029 }
 0x303   :  { %v236_v54 = vadd.f32 1.0, %v1030_v53  ;;  %v100_v53 = vpop.f32.mrf.mxu0 }
 0x305   :  { %1031 = vrcp.f32 %v236_v54  ;;  %v248_v60 = vand.u32 2147483648, %v236_v54  ;;  %vm242_vm9 = vweird.f32 %v236_v54  ;;  %v246_v61 = vand.u32 2147483647, %v236_v54 }
 0x307   :  { %v249_v63 = vor.u32 1.1754944e-38, %v248_v60  ;;  %vm247_vm11 = vcmp.eq.f32.partialorder %v246_v61, 8.507059e+37 }
 0x30b   :  { %v1032_v55 = vpop.eup %1031 }
 0x30c   :  { %v238_v56 = vmul.f32 %v1032_v55, %v236_v54  ;;  %vm243_vm8 = vweird.f32 %v1032_v55  ;;  %v101_v54 = vadd.f32 %v1208_v14, %v100_v53 }
 0x30d   :  { %vm244_vm10 = vmor %vm242_vm9, %vm243_vm8  ;;  %vm445_vm9 = vcmp.ne.f32.partialorder %v444_v22, 0.0 }
 0x30e   :  { %v239_v57 = vsub.f32 1.0, %v238_v56 }
 0x310   :  { %v240_v58 = vmul.f32 %v1032_v55, %v239_v57 }
 0x312   :  { %v241_v59 = vadd.f32 %v1032_v55, %v240_v58 }
 0x314   :  { %v245_v62 = vsel %vm244_vm10, %v1032_v55, %v241_v59 }
 0x315   :  { %v250_v1 = vsel %vm247_vm11, %v249_v63, %v245_v62 }
 0x316   :  { %v257_v7 = vmul.f32 %v255_v5, %v250_v1 }
 0x35b   :  { %v260_v0 = vpop.permute.xlu2 %259 }
 0x35c   :  { %v262_v2 = vmul.f32 %v260_v0, %v250_v1 }
 0x35e   :  { %264 = vrot.lane.b32.xlu1 %v262_v2, %s1085_s3 }
 0x3d0   :  { %v265_v9 = vpop.permute.xlu1 %264 }
 0x3d1   :  { %v267_v10 = vadd.f32 %v265_v9, %v257_v7 }
 0x3d3   :  { %1033 = vtanh.f32 %v267_v10  ;;  %282 = vrot.lane.b32.xlu1 %v267_v10, %s1086_s10 }
 0x3d9   :  { %v1034_v11 = vpop.eup %1033 }
 0x3da   :  { %270 = vrot.lane.b32.xlu2 %v1034_v11, %s1084_s9 }
 0x434   :  { %v271_v12 = vpop.permute.xlu2 %270 }
 0x435   :  { %v273_v13 = vmul.f32 %v271_v12, %v250_v1 }
 0x437   :  { %277 = vrot.lane.b32.xlu0 %v273_v13, %s1085_s3 }
 0x445   :  { %v283_v16 = vpop.permute.xlu1 %282 }
 0x446   :  { %v285_v17 = vsel %vm275_vm12, %v283_v16, %v201_v41 }
 0x447   :  { %339 = vrot.lane.b32.xlu0 %v285_v17, %s1085_s3 }
 0x4a9   :  { %v278_v19 = vpop.permute.xlu0 %277 }
 0x4aa   :  { %v280_v20 = vsel %vm275_vm12, %v278_v19, %v1224_v46  ;;  %v1249_v21 = vsel %vm275_vm12, %v278_v19, 0.0 }
 0x4ab   :  { %287 = vst.msk [vmem:[#allocation3 + $0x8] sm:$0xff] %vm202_vm6, %v1249_v21  ;;  %982 = vmatmul.msk.f32.vlgmr.msrb.gmra.mxu2 %vm128_vm7, %v280_v20 }
 0x4ac   :  { %734 = vmatpush.msrb.mxu2 %v1145_v3 }
 0x4ae   :  { %735 = vmatpush.msrb.mxu2 %v1150_v4 }
 0x4b0   :  { %736 = vmatpush.msrb.mxu2 %v1159_v6 }
 0x4b2   :  { %737 = vmatpush.msrb.mxu2 %v1170_v8 }
 0x4b9   :  { %v340_v38 = vpop.permute.xlu0 %339 }
 0x52e   :  { %v314_v24 = vpop.f32.mrf.mxu2 }
 0x52f   :  { %v317_v25 = vadd.f32 %v314_v24, %v98_v23 }
 0x531   :  { %1035 = vtanh.f32 %v317_v25  ;;  %v983_v27 = vmul.f32 -1.442695, %v317_v25  ;;  %v33_v25 = vld [vmem:[%s1439_s0 + $0x20] sm:$0xff] }
 0x532   :  { %975 = vmatmul.msk.f32.gmra.mxu0 %vm49_vm0, %v33_v25 }
 0x533   :  { %1037 = vpow2.f32 %v983_v27 }
 0x537   :  { %v1036_v26 = vpop.eup %1035 }
 0x538   :  { %344 = vrot.lane.b32.xlu2 %v1036_v26, %s1084_s9 }
 0x539   :  { %v1038_v28 = vpop.eup %1037 }
 0x53a   :  { %v321_v29 = vadd.f32 1.0, %v1038_v28 }
 0x53c   :  { %1039 = vrcp.f32 %v321_v29  ;;  %v333_v8 = vand.u32 2147483648, %v321_v29  ;;  %vm327_vm14 = vweird.f32 %v321_v29  ;;  %v331_v32 = vand.u32 2147483647, %v321_v29 }
 0x53e   :  { %v334_v34 = vor.u32 1.1754944e-38, %v333_v8  ;;  %vm332_vm1 = vcmp.eq.f32.partialorder %v331_v32, 8.507059e+37 }
 0x542   :  { %v1040_v3 = vpop.eup %1039 }
 0x543   :  { %v323_v4 = vmul.f32 %v1040_v3, %v321_v29  ;;  %vm328_vm13 = vweird.f32 %v1040_v3 }
 0x544   :  { %vm329_vm15 = vmor %vm327_vm14, %vm328_vm13 }
 0x545   :  { %v324_v30 = vsub.f32 1.0, %v323_v4 }
 0x547   :  { %v325_v6 = vmul.f32 %v1040_v3, %v324_v30 }
 0x549   :  { %v326_v31 = vadd.f32 %v1040_v3, %v325_v6 }
 0x54b   :  { %v330_v33 = vsel %vm329_vm15, %v1040_v3, %v326_v31 }
 0x54c   :  { %v335_v36 = vsel %vm332_vm1, %v334_v34, %v330_v33 }
 0x54d   :  { %v342_v39 = vmul.f32 %v340_v38, %v335_v36 }
 0x592   :  { %v345_v35 = vpop.permute.xlu2 %344 }
 0x593   :  { %v347_v37 = vmul.f32 %v345_v35, %v335_v36 }
 0x595   :  { %349 = vrot.lane.b32.xlu1 %v347_v37, %s1085_s3 }
 0x5af   :  { %v103_v29 = vpop.f32.mrf.mxu0 }
 0x5b0   :  { %v104_v3 = vadd.f32 %v1208_v14, %v103_v29  ;;  %v35_v29 = vld [vmem:[%s1439_s0 + $0x30] sm:$0xff] }
 0x607   :  { %v350_v40 = vpop.permute.xlu1 %349 }
 0x608   :  { %v352_v41 = vadd.f32 %v350_v40, %v342_v39 }
 0x60a   :  { %1041 = vtanh.f32 %v352_v41  ;;  %367 = vrot.lane.b32.xlu1 %v352_v41, %s1086_s10 }
 0x610   :  { %v1042_v42 = vpop.eup %1041 }
 0x611   :  { %355 = vrot.lane.b32.xlu2 %v1042_v42, %s1084_s9 }
 0x66b   :  { %v356_v44 = vpop.permute.xlu2 %355 }
 0x66c   :  { %v358_v45 = vmul.f32 %v356_v44, %v335_v36 }
 0x66e   :  { %362 = vrot.lane.b32.xlu0 %v358_v45, %s1085_s3 }
 0x67c   :  { %v368_v48 = vpop.permute.xlu1 %367 }
 0x67d   :  { %v370_v49 = vsel %vm360_vm2, %v368_v48, %v285_v17 }
 0x67e   :  { %424 = vrot.lane.b32.xlu0 %v370_v49, %s1085_s3 }
 0x6e0   :  { %v363_v50 = vpop.permute.xlu0 %362 }
 0x6e1   :  { %v365_v51 = vsel %vm360_vm2, %v363_v50, %v280_v20  ;;  %v1272_v52 = vsel %vm360_vm2, %v363_v50, 0.0 }
 0x6e2   :  { %372 = vst.msk [vmem:[#allocation3 + $0x10] sm:$0xff] %vm202_vm6, %v1272_v52  ;;  %984 = vmatmul.msk.f32.vlgmr.msrb.gmra.mxu1 %vm128_vm7, %v365_v51 }
 0x6f0   :  { %v425_v13 = vpop.permute.xlu0 %424 }
 0x75f   :  { %v399_v55 = vpop.f32.mrf.mxu1 }
 0x760   :  { %v402_v56 = vadd.f32 %v399_v55, %v101_v54  ;;  %v529_v54 = vld [vmem:[%s1440_s1 + $0x20] sm:$0xff] }
 0x761   :  { %vm530_vm14 = vcmp.ne.f32.partialorder %v529_v54, 0.0 }
 0x762   :  { %1043 = vtanh.f32 %v402_v56  ;;  %v985_v58 = vmul.f32 -1.442695, %v402_v56 }
 0x764   :  { %1045 = vpow2.f32 %v985_v58 }
 0x768   :  { %v1044_v57 = vpop.eup %1043 }
 0x769   :  { %429 = vrot.lane.b32.xlu2 %v1044_v57, %s1084_s9  ;;  %v34_v57 = vld [vmem:[%s1439_s0 + $0x28] sm:$0xff] }
 0x76a   :  { %v1046_v59 = vpop.eup %1045  ;;  %976 = vmatmul.msk.f32.gmra.mxu0 %vm49_vm0, %v34_v57 }
 0x76b   :  { %v406_v60 = vadd.f32 1.0, %v1046_v59 }
 0x76d   :  { %1047 = vrcp.f32 %v406_v60  ;;  %v418_v2 = vand.u32 2147483648, %v406_v60  ;;  %vm412_vm4 = vweird.f32 %v406_v60  ;;  %v416_v5 = vand.u32 2147483647, %v406_v60 }
 0x76f   :  { %v419_v9 = vor.u32 1.1754944e-38, %v418_v2  ;;  %vm417_vm8 = vcmp.eq.f32.partialorder %v416_v5, 8.507059e+37 }
 0x772   :  { %977 = vmatmul.msk.f32.gmra.mxu0 %vm49_vm0, %v35_v29 }
 0x773   :  { %v1048_v61 = vpop.eup %1047 }
 0x774   :  { %v408_v62 = vmul.f32 %v1048_v61, %v406_v60  ;;  %vm413_vm3 = vweird.f32 %v1048_v61 }
 0x775   :  { %vm414_vm5 = vmor %vm412_vm4, %vm413_vm3 }
 0x776   :  { %v409_v63 = vsub.f32 1.0, %v408_v62 }
 0x778   :  { %v410_v0 = vmul.f32 %v1048_v61, %v409_v63 }
 0x77a   :  { %v411_v1 = vadd.f32 %v1048_v61, %v410_v0 }
 0x77c   :  { %v415_v7 = vsel %vm414_vm5, %v1048_v61, %v411_v1 }
 0x77d   :  { %v420_v11 = vsel %vm417_vm8, %v419_v9, %v415_v7 }
 0x77e   :  { %v427_v15 = vmul.f32 %v425_v13, %v420_v11 }
 0x7c3   :  { %v430_v10 = vpop.permute.xlu2 %429 }
 0x7c4   :  { %v432_v12 = vmul.f32 %v430_v10, %v420_v11 }
 0x7c6   :  { %434 = vrot.lane.b32.xlu1 %v432_v12, %s1085_s3 }
 0x7e7   :  { %v106_v61 = vpop.f32.mrf.mxu0 }
 0x7e8   :  { %v107_v62 = vadd.f32 %v1208_v14, %v106_v61 }
 0x838   :  { %v435_v16 = vpop.permute.xlu1 %434 }
 0x839   :  { %v437_v17 = vadd.f32 %v435_v16, %v427_v15 }
 0x83b   :  { %1049 = vtanh.f32 %v437_v17  ;;  %452 = vrot.lane.b32.xlu1 %v437_v17, %s1086_s10 }
 0x841   :  { %v1050_v18 = vpop.eup %1049 }
 0x842   :  { %440 = vrot.lane.b32.xlu2 %v1050_v18, %s1084_s9 }
 0x89c   :  { %v441_v19 = vpop.permute.xlu2 %440 }
 0x89d   :  { %v443_v20 = vmul.f32 %v441_v19, %v420_v11 }
 0x89f   :  { %447 = vrot.lane.b32.xlu0 %v443_v20, %s1085_s3 }
 0x8ad   :  { %v453_v23 = vpop.permute.xlu1 %452 }
 0x8ae   :  { %v455_v24 = vsel %vm445_vm9, %v453_v23, %v370_v49 }
 0x8af   :  { %509 = vrot.lane.b32.xlu0 %v455_v24, %s1085_s3 }
 0x911   :  { %v448_v26 = vpop.permute.xlu0 %447 }
 0x912   :  { %v450_v27 = vsel %vm445_vm9, %v448_v26, %v365_v51  ;;  %v1291_v28 = vsel %vm445_vm9, %v448_v26, 0.0 }
 0x913   :  { %457 = vst.msk [vmem:[#allocation3 + $0x18] sm:$0xff] %vm202_vm6, %v1291_v28  ;;  %986 = vmatmul.msk.f32.vlgmr.msra.gmra.mxu2 %vm128_vm7, %v450_v27 }
 0x921   :  { %v510_v45 = vpop.permute.xlu0 %509 }
 0x996   :  { %v484_v4 = vpop.f32.mrf.mxu2 }
 0x997   :  { %v487_v30 = vadd.f32 %v484_v4, %v104_v3 }
 0x999   :  { %1051 = vtanh.f32 %v487_v30  ;;  %v987_v31 = vmul.f32 -1.442695, %v487_v30  ;;  %v614_v30 = vld [vmem:[%s1440_s1 + $0x28] sm:$0xff] }
 0x99a   :  { %vm615_vm4 = vcmp.ne.f32.partialorder %v614_v30, 0.0 }
 0x99b   :  { %1053 = vpow2.f32 %v987_v31 }
 0x99f   :  { %v1052_v6 = vpop.eup %1051 }
 0x9a0   :  { %514 = vrot.lane.b32.xlu2 %v1052_v6, %s1084_s9 }
 0x9a1   :  { %v1054_v8 = vpop.eup %1053 }
 0x9a2   :  { %v491_v32 = vadd.f32 1.0, %v1054_v8  ;;  %v806_v8 = vld [vmem:[%s1441_s5 + $0x8] sm:$0xff] }
 0x9a3   :  { %920 = vmatpush.msrb.mxu1 %v806_v8  ;;  %1010 = vmatpush.msra.mxu2 %v806_v8 }
 0x9a4   :  { %1055 = vrcp.f32 %v491_v32  ;;  %v503_v38 = vand.u32 2147483648, %v491_v32  ;;  %vm497_vm11 = vweird.f32 %v491_v32  ;;  %v501_v39 = vand.u32 2147483647, %v491_v32 }
 0x9a6   :  { %v504_v41 = vor.u32 1.1754944e-38, %v503_v38  ;;  %vm502_vm13 = vcmp.eq.f32.partialorder %v501_v39, 8.507059e+37  ;;  %v799_v38 = vld [vmem:[#allocation3 + $0x10] sm:$0xff]  ;;  %v800_v39 = vld [vmem:[#allocation3 + $0x18] sm:$0xff] }
 0x9aa   :  { %v1056_v33 = vpop.eup %1055 }
 0x9ab   :  { %v493_v34 = vmul.f32 %v1056_v33, %v491_v32  ;;  %vm498_vm10 = vweird.f32 %v1056_v33  ;;  %v805_v32 = vld [vmem:[%s1441_s5] sm:$0xff] }
 0x9ac   :  { %vm499_vm12 = vmor %vm497_vm11, %vm498_vm10  ;;  %921 = vmatpush.msrb.mxu1 %v805_v32  ;;  %1011 = vmatpush.msra.mxu2 %v805_v32 }
 0x9ad   :  { %v494_v35 = vsub.f32 1.0, %v493_v34 }
 0x9af   :  { %v495_v36 = vmul.f32 %v1056_v33, %v494_v35 }
 0x9b1   :  { %v496_v37 = vadd.f32 %v1056_v33, %v495_v36  ;;  %v797_v36 = vld [vmem:[#allocation3] sm:$0xff] }
 0x9b3   :  { %v500_v40 = vsel %vm499_vm12, %v1056_v33, %v496_v37  ;;  %v798_v37 = vld [vmem:[#allocation3 + $0x8] sm:$0xff] }
 0x9b4   :  { %v505_v43 = vsel %vm502_vm13, %v504_v41, %v500_v40 }
 0x9b5   :  { %v512_v47 = vmul.f32 %v510_v45, %v505_v43 }
 0x9fa   :  { %v515_v42 = vpop.permute.xlu2 %514 }
 0x9fb   :  { %v517_v44 = vmul.f32 %v515_v42, %v505_v43  ;;  %v109_v42 = vpop.f32.mrf.mxu0 }
 0x9fd   :  { %519 = vrot.lane.b32.xlu1 %v517_v44, %s1085_s3 }
 0xa6f   :  { %v520_v48 = vpop.permute.xlu1 %519 }
 0xa70   :  { %v522_v49 = vadd.f32 %v520_v48, %v512_v47 }
 0xa72   :  { %1057 = vtanh.f32 %v522_v49  ;;  %537 = vrot.lane.b32.xlu1 %v522_v49, %s1086_s10 }
 0xa78   :  { %v1058_v50 = vpop.eup %1057 }
 0xa79   :  { %525 = vrot.lane.b32.xlu2 %v1058_v50, %s1084_s9 }
 0xad3   :  { %v526_v51 = vpop.permute.xlu2 %525 }
 0xad4   :  { %v528_v53 = vmul.f32 %v526_v51, %v505_v43  ;;  %v110_v43 = vadd.f32 %v1208_v14, %v109_v42 }
 0xad6   :  { %532 = vrot.lane.b32.xlu0 %v528_v53, %s1085_s3 }
 0xae4   :  { %v538_v55 = vpop.permute.xlu1 %537 }
 0xae5   :  { %v540_v56 = vsel %vm530_vm14, %v538_v55, %v455_v24 }
 0xae6   :  { %594 = vrot.lane.b32.xlu0 %v540_v56, %s1085_s3 }
 0xb48   :  { %v533_v58 = vpop.permute.xlu0 %532 }
 0xb49   :  { %v1310_v59 = vsel %vm530_vm14, %v533_v58, 0.0  ;;  %v535_v60 = vsel %vm530_vm14, %v533_v58, %v450_v27 }
 0xb4a   :  { %542 = vst.msk [vmem:[#allocation3 + $0x20] sm:$0xff] %vm202_vm6, %v1310_v59  ;;  %988 = vmatmul.msk.f32.vlgmr.msra.gmra.mxu3 %vm128_vm7, %v535_v60 }
 0xb51   :  { %v801_v40 = vld [vmem:[#allocation3 + $0x20] sm:$0xff] }
 0xb58   :  { %v595_v23 = vpop.permute.xlu0 %594 }
 0xbcd   :  { %v569_v63 = vpop.f32.mrf.mxu3 }
 0xbce   :  { %v572_v0 = vadd.f32 %v569_v63, %v107_v62 }
 0xbd0   :  { %1059 = vtanh.f32 %v572_v0  ;;  %v989_v2 = vmul.f32 -1.442695, %v572_v0 }
 0xbd2   :  { %1061 = vpow2.f32 %v989_v2 }
 0xbd6   :  { %v1060_v1 = vpop.eup %1059 }
 0xbd7   :  { %599 = vrot.lane.b32.xlu2 %v1060_v1, %s1084_s9 }
 0xbd8   :  { %v1062_v5 = vpop.eup %1061 }
 0xbd9   :  { %v576_v7 = vadd.f32 1.0, %v1062_v5 }
 0xbdb   :  { %1063 = vrcp.f32 %v576_v7  ;;  %v588_v15 = vand.u32 2147483648, %v576_v7  ;;  %vm582_vm1 = vweird.f32 %v576_v7  ;;  %v586_v16 = vand.u32 2147483647, %v576_v7 }
 0xbdd   :  { %v589_v18 = vor.u32 1.1754944e-38, %v588_v15  ;;  %vm587_vm3 = vcmp.eq.f32.partialorder %v586_v16, 8.507059e+37  ;;  %v36_v16 = vld [vmem:[%s1439_s0 + $0x38] sm:$0xff]  ;;  %s1087_s0 = smov 112  }
 0xbde   :  { %978 = vmatmul.msk.f32.gmra.mxu0 %vm49_vm0, %v36_v16 }
 0xbe1   :  { %v1064_v9 = vpop.eup %1063 }
 0xbe2   :  { %v578_v10 = vmul.f32 %v1064_v9, %v576_v7  ;;  %vm583_vm15 = vweird.f32 %v1064_v9 }
 0xbe3   :  { %vm584_vm2 = vmor %vm582_vm1, %vm583_vm15 }
 0xbe4   :  { %v579_v11 = vsub.f32 1.0, %v578_v10 }
 0xbe6   :  { %v580_v12 = vmul.f32 %v1064_v9, %v579_v11 }
 0xbe8   :  { %v581_v13 = vadd.f32 %v1064_v9, %v580_v12  ;;  %v699_v12 = vld [vmem:[%s1440_s1 + $0x30] sm:$0xff] }
 0xbe9   :  { %vm700_vm11 = vcmp.ne.f32.partialorder %v699_v12, 0.0 }
 0xbea   :  { %v585_v17 = vsel %vm584_vm2, %v1064_v9, %v581_v13 }
 0xbeb   :  { %v590_v20 = vsel %vm587_vm3, %v589_v18, %v585_v17 }
 0xbec   :  { %v597_v24 = vmul.f32 %v595_v23, %v590_v20 }
 0xc31   :  { %v600_v19 = vpop.permute.xlu2 %599 }
 0xc32   :  { %v602_v22 = vmul.f32 %v600_v19, %v590_v20 }
 0xc34   :  { %604 = vrot.lane.b32.xlu1 %v602_v22, %s1085_s3 }
 0xc5b   :  { %v112_v22 = vpop.f32.mrf.mxu0 }
 0xc5c   :  { %v113_v23 = vadd.f32 %v1208_v14, %v112_v22 }
 0xca6   :  { %v605_v25 = vpop.permute.xlu1 %604 }
 0xca7   :  { %v607_v26 = vadd.f32 %v605_v25, %v597_v24 }
 0xca9   :  { %1065 = vtanh.f32 %v607_v26  ;;  %622 = vrot.lane.b32.xlu1 %v607_v26, %s1086_s10 }
 0xcaf   :  { %v1066_v27 = vpop.eup %1065 }
 0xcb0   :  { %610 = vrot.lane.b32.xlu2 %v1066_v27, %s1084_s9 }
 0xd0a   :  { %v611_v3 = vpop.permute.xlu2 %610 }
 0xd0b   :  { %v613_v4 = vmul.f32 %v611_v3, %v590_v20 }
 0xd0d   :  { %617 = vrot.lane.b32.xlu0 %v613_v4, %s1085_s3 }
 0xd1b   :  { %v623_v6 = vpop.permute.xlu1 %622 }
 0xd1c   :  { %v1328_v31 = vsel %vm615_vm4, %v623_v6, %v540_v56 }
 0xd1d   :  { %679 = vrot.lane.b32.xlu0 %v1328_v31, %s1085_s3 }
 0xd7f   :  { %v618_v33 = vpop.permute.xlu0 %617 }
 0xd80   :  { %v1338_v34 = vsel %vm615_vm4, %v618_v33, %v535_v60  ;;  %v1340_v35 = vsel %vm615_vm4, %v618_v33, 0.0 }
 0xd81   :  { %627 = vst.msk [vmem:[#allocation3 + $0x28] sm:$0xff] %vm202_vm6, %v1340_v35  ;;  %990 = vmatmul.msk.f32.vlgmr.msra.gmra.mxu1 %vm128_vm7, %v1338_v34 }
 0xd88   :  { %v802_v41 = vld [vmem:[#allocation3 + $0x28] sm:$0xff] }
 0xd89   :  { %1002 = vmatmul.msk.f32.vlgmr.msrb.gmra.mxu1 %vm202_vm6, %v797_v36 }
 0xd8f   :  { %v680_v1 = vpop.permute.xlu0 %679 }
 0xd91   :  { %1003 = vmatmul.msk.f32.gmra.mxu1 %vm202_vm6, %v798_v37 }
 0xd99   :  { %1004 = vmatmul.msk.f32.gmra.mxu1 %vm202_vm6, %v799_v38 }
 0xda1   :  { %1005 = vmatmul.msk.f32.gmra.mxu1 %vm202_vm6, %v800_v39 }
 0xda9   :  { %1006 = vmatmul.msk.f32.gmra.mxu1 %vm202_vm6, %v801_v40 }
 0xdb1   :  { %1007 = vmatmul.msk.f32.gmra.mxu1 %vm202_vm6, %v802_v41 }
 0xdfe   :  { %v654_v44 = vpop.f32.mrf.mxu1 }
 0xdff   :  { %v657_v45 = vadd.f32 %v654_v44, %v110_v43 }
 0xe01   :  { %1067 = vtanh.f32 %v657_v45  ;;  %v991_v48 = vmul.f32 -1.442695, %v657_v45 }
 0xe03   :  { %1069 = vpow2.f32 %v991_v48 }
 0xe07   :  { %v1068_v47 = vpop.eup %1067 }
 0xe08   :  { %684 = vrot.lane.b32.xlu2 %v1068_v47, %s1084_s9 }
 0xe09   :  { %v1070_v49 = vpop.eup %1069 }
 0xe0a   :  { %v661_v50 = vadd.f32 1.0, %v1070_v49 }
 0xe0c   :  { %1071 = vrcp.f32 %v661_v50  ;;  %v673_v57 = vand.u32 2147483648, %v661_v50  ;;  %vm667_vm8 = vweird.f32 %v661_v50  ;;  %v671_v58 = vand.u32 2147483647, %v661_v50 }
 0xe0e   :  { %v674_v61 = vor.u32 1.1754944e-38, %v673_v57  ;;  %vm672_vm10 = vcmp.eq.f32.partialorder %v671_v58, 8.507059e+37 }
 0xe12   :  { %v1072_v51 = vpop.eup %1071 }
 0xe13   :  { %v663_v53 = vmul.f32 %v1072_v51, %v661_v50  ;;  %vm668_vm5 = vweird.f32 %v1072_v51 }
 0xe14   :  { %vm669_vm9 = vmor %vm667_vm8, %vm668_vm5 }
 0xe15   :  { %v664_v54 = vsub.f32 1.0, %v663_v53  ;;  %v816_v53 = vld [vmem:[%s1443_s6 + $0x8] sm:$0xff] }
 0xe16   :  { %855 = vmatpush.msrb.mxu3 %v816_v53 }
 0xe17   :  { %v665_v55 = vmul.f32 %v1072_v51, %v664_v54  ;;  %v815_v54 = vld [vmem:[%s1443_s6] sm:$0xff] }
 0xe18   :  { %856 = vmatpush.msrb.mxu3 %v815_v54 }
 0xe19   :  { %v666_v56 = vadd.f32 %v1072_v51, %v665_v55 }
 0xe1b   :  { %v670_v60 = vsel %vm669_vm9, %v1072_v51, %v666_v56 }
 0xe1c   :  { %v675_v63 = vsel %vm672_vm10, %v674_v61, %v670_v60 }
 0xe1d   :  { %v682_v2 = vmul.f32 %v680_v1, %v675_v63  ;;  %v923_v1 = vpop.f32.mrf.mxu1 }
 0xe62   :  { %v685_v62 = vpop.permute.xlu2 %684 }
 0xe63   :  { %v687_v0 = vmul.f32 %v685_v62, %v675_v63 }
 0xe65   :  { %689 = vrot.lane.b32.xlu1 %v687_v0, %s1085_s3 }
 0xed7   :  { %v690_v5 = vpop.permute.xlu1 %689 }
 0xed8   :  { %v692_v7 = vadd.f32 %v690_v5, %v682_v2  ;;  %v1018_v2 = vld [vmem:[%s1442_s7] ss:$0 sm:$0xff]  ;;  %v926_v5 = vpop.f32.mrf.mxu1 }
 0xeda   :  { %1073 = vtanh.f32 %v692_v7  ;;  %707 = vrot.lane.b32.xlu1 %v692_v7, %s1086_s10 }
 0xee0   :  { %v1074_v9 = vpop.eup %1073 }
 0xee1   :  { %695 = vrot.lane.b32.xlu2 %v1074_v9, %s1084_s9 }
 0xf3b   :  { %v696_v10 = vpop.permute.xlu2 %695 }
 0xf3c   :  { %v698_v11 = vmul.f32 %v696_v10, %v675_v63 }
 0xf3e   :  { %702 = vrot.lane.b32.xlu0 %v698_v11, %s1085_s3 }
 0xf4c   :  { %v708_v13 = vpop.permute.xlu1 %707 }
 0xf4d   :  { %v710_v15 = vsel %vm700_vm11, %v708_v13, %v1328_v31  ;;  %v929_v13 = vpop.f32.mrf.mxu1 }
 0xf4e   :  { %764 = vrot.lane.b32.xlu0 %v710_v15, %s1085_s3 }
 0xfb0   :  { %v703_v17 = vpop.permute.xlu0 %702 }
 0xfb1   :  { %v705_v18 = vsel %vm700_vm11, %v703_v17, %v1338_v34  ;;  %v711_v19 = vsel %vm700_vm11, %v703_v17, 0.0 }
 0xfb2   :  { %712 = vst.msk [vmem:[#allocation3 + $0x30] sm:$0xff] %vm202_vm6, %v711_v19  ;;  %992 = vmatmul.msk.f32.vlgmr.msrb.gmra.mxu2 %vm128_vm7, %v705_v18 }
 0xfb9   :  { %v803_v20 = vld [vmem:[#allocation3 + $0x30] sm:$0xff] }
 0xfba   :  { %1008 = vmatmul.msk.f32.vlgmr.msra.gmra.mxu2 %vm202_vm6, %v803_v20 }
 0xfc0   :  { %v765_v39 = vpop.permute.xlu0 %764 }
0x1035   :  { %v739_v24 = vpop.f32.mrf.mxu2 }
0x1036   :  { %v742_v25 = vadd.f32 %v739_v24, %v113_v23 }
0x1038   :  { %1075 = vtanh.f32 %v742_v25  ;;  %v993_v27 = vmul.f32 -1.442695, %v742_v25 }
0x103a   :  { %1077 = vpow2.f32 %v993_v27 }
0x103e   :  { %v1076_v26 = vpop.eup %1075 }
0x103f   :  { %769 = vrot.lane.b32.xlu2 %v1076_v26, %s1084_s9 }
0x1040   :  { %v1078_v29 = vpop.eup %1077 }
0x1041   :  { %v746_v3 = vadd.f32 1.0, %v1078_v29 }
0x1043   :  { %1079 = vrcp.f32 %v746_v3  ;;  %v758_v32 = vand.u32 2147483648, %v746_v3  ;;  %vm752_vm7 = vweird.f32 %v746_v3  ;;  %v756_v14 = vand.u32 2147483647, %v746_v3 }
0x1045   :  { %v759_v34 = vor.u32 1.1754944e-38, %v758_v32  ;;  %vm757_vm13 = vcmp.eq.f32.partialorder %v756_v14, 8.507059e+37 }
0x1049   :  { %v1080_v4 = vpop.eup %1079 }
0x104a   :  { %v748_v30 = vmul.f32 %v1080_v4, %v746_v3  ;;  %vm753_vm0 = vweird.f32 %v1080_v4 }
0x104b   :  { %vm754_vm12 = vmor %vm752_vm7, %vm753_vm0 }
0x104c   :  { %v749_v6 = vsub.f32 1.0, %v748_v30 }
0x104e   :  { %v750_v31 = vmul.f32 %v1080_v4, %v749_v6  ;;  %v941_v6 = vpop.f32.mrf.mxu2 }
0x1050   :  { %v751_v8 = vadd.f32 %v1080_v4, %v750_v31 }
0x1052   :  { %v755_v33 = vsel %vm754_vm12, %v1080_v4, %v751_v8 }
0x1053   :  { %v760_v37 = vsel %vm757_vm13, %v759_v34, %v755_v33 }
0x1054   :  { %v767_v40 = vmul.f32 %v765_v39, %v760_v37 }
0x1099   :  { %v770_v36 = vpop.permute.xlu2 %769 }
0x109a   :  { %v772_v38 = vmul.f32 %v770_v36, %v760_v37 }
0x109c   :  { %774 = vrot.lane.b32.xlu1 %v772_v38, %s1085_s3 }
0x110e   :  { %v775_v41 = vpop.permute.xlu1 %774 }
0x110f   :  { %v777_v42 = vadd.f32 %v775_v41, %v767_v40 }
0x1111   :  { %1081 = vtanh.f32 %v777_v42 }
0x1117   :  { %v1082_v43 = vpop.eup %1081 }
0x1118   :  { %780 = vrot.lane.b32.xlu2 %v1082_v43, %s1084_s9 }
0x1120   :  { %714 = vrot.lane.b32.xlu2 %v711_v19, %s1087_s0  ;;  %v932_v19 = vpop.f32.mrf.mxu1 }
0x1128   :  { %459 = vrot.lane.b32.xlu2 %v1291_v28, %s1087_s0  ;;  %v935_v24 = vpop.f32.mrf.mxu1 }
0x1130   :  { %205 = vrot.lane.b32.xlu2 %v1224_v46, %s1087_s0  ;;  %v784_v46 = vld [vmem:[%s1440_s1 + $0x38] sm:$0xff]  ;;  %v938_v29 = vpop.f32.mrf.mxu1 }
0x1131   :  { %vm785_vm14 = vcmp.ne.f32.partialorder %v784_v46, 0.0 }
0x1172   :  { %v781_v44 = vpop.permute.xlu2 %780 }
0x1173   :  { %v783_v45 = vmul.f32 %v781_v44, %v760_v37 }
0x1175   :  { %787 = vrot.lane.b32.xlu0 %v783_v45, %s1085_s3 }
0x117a   :  { %v715_v47 = vpop.permute.xlu2 %714 }
0x117b   :  { %717 = vst.msk [vmem:[#allocation4 + $0x8] sm:$0xff] %vm202_vm6, %v715_v47 }
0x117d   :  { %629 = vrot.lane.b32.xlu0 %v1340_v35, %s1087_s0 }
0x1182   :  { %v460_v48 = vpop.permute.xlu2 %459  ;;  %v808_v57 = vld [vmem:[#allocation4 + $0x8] sm:$0xff] }
0x1183   :  { %462 = vst.msk [vmem:[#allocation4 + $0x20] sm:$0xff] %vm202_vm6, %v460_v48 }
0x1185   :  { %374 = vrot.lane.b32.xlu0 %v1272_v52, %s1087_s0 }
0x118a   :  { %v206_v49 = vpop.permute.xlu2 %205  ;;  %v811_v61 = vld [vmem:[#allocation4 + $0x20] sm:$0xff] }
0x118b   :  { %208 = vst.msk [vmem:[#allocation4 + $0x38] sm:$0xff] %vm202_vm6, %v206_v49 }
0x1192   :  { %v814_v0 = vld [vmem:[#allocation4 + $0x38] sm:$0xff] }
0x11e7   :  { %v788_v28 = vpop.permute.xlu0 %787 }
0x11e8   :  { %v790_v50 = vsel %vm785_vm14, %v788_v28, 0.0 }
0x11e9   :  { %791 = vst.msk [vmem:[#allocation3 + $0x38] sm:$0xff] %vm202_vm6, %v790_v50  ;;  %793 = vrot.lane.b32.xlu1 %v790_v50, %s1087_s0 }
0x11ef   :  { %v630_v51 = vpop.permute.xlu0 %629 }
0x11f0   :  { %632 = vst.msk [vmem:[#allocation4 + $0x10] sm:$0xff] %vm202_vm6, %v630_v51  ;;  %v804_v35 = vld [vmem:[#allocation3 + $0x38] sm:$0xff] }
0x11f1   :  { %544 = vrot.lane.b32.xlu1 %v1310_v59, %s1087_s0  ;;  %1009 = vmatmul.msk.f32.gmra.mxu2 %vm202_vm6, %v804_v35 }
0x11f7   :  { %v375_v52 = vpop.permute.xlu0 %374  ;;  %v809_v58 = vld [vmem:[#allocation4 + $0x10] sm:$0xff] }
0x11f8   :  { %377 = vst.msk [vmem:[#allocation4 + $0x28] sm:$0xff] %vm202_vm6, %v375_v52 }
0x11f9   :  { %289 = vrot.lane.b32.xlu1 %v1249_v21, %s1087_s0 }
0x11ff   :  { %v812_v62 = vld [vmem:[#allocation4 + $0x28] sm:$0xff] }
0x125b   :  { %v794_v55 = vpop.permute.xlu1 %793 }
0x125c   :  { %796 = vst.msk [vmem:[#allocation4] sm:$0xff] %vm202_vm6, %v794_v55 }
0x1263   :  { %v545_v59 = vpop.permute.xlu1 %544  ;;  %v807_v56 = vld [vmem:[#allocation4] sm:$0xff] }
0x1264   :  { %547 = vst.msk [vmem:[#allocation4 + $0x18] sm:$0xff] %vm202_vm6, %v545_v59  ;;  %994 = vmatmul.msk.f32.vlgmr.msrb.gmra.mxu3 %vm202_vm6, %v807_v56 }
0x126b   :  { %v290_v21 = vpop.permute.xlu1 %289  ;;  %v810_v60 = vld [vmem:[#allocation4 + $0x18] sm:$0xff] }
0x126c   :  { %292 = vst.msk [vmem:[#allocation4 + $0x30] sm:$0xff] %vm202_vm6, %v290_v21  ;;  %995 = vmatmul.msk.f32.gmra.mxu3 %vm202_vm6, %v808_v57 }
0x1273   :  { %v813_v63 = vld [vmem:[#allocation4 + $0x30] sm:$0xff] }
0x1274   :  { %996 = vmatmul.msk.f32.gmra.mxu3 %vm202_vm6, %v809_v58  ;;  %v944_v14 = vpop.f32.mrf.mxu2 }
0x127c   :  { %997 = vmatmul.msk.f32.gmra.mxu3 %vm202_vm6, %v810_v60 }
0x1284   :  { %998 = vmatmul.msk.f32.gmra.mxu3 %vm202_vm6, %v811_v61 }
0x128c   :  { %999 = vmatmul.msk.f32.gmra.mxu3 %vm202_vm6, %v812_v62 }
0x1294   :  { %1000 = vmatmul.msk.f32.gmra.mxu3 %vm202_vm6, %v813_v63 }
0x129c   :  { %1001 = vmatmul.msk.f32.gmra.mxu3 %vm202_vm6, %v814_v0 }
0x12e7   :  { %v858_v7 = vpop.f32.mrf.mxu3 }
0x12e8   :  { %v924_v9 = vadd.f32 %v923_v1, %v858_v7 }
0x12ea   :  { %v951_v10 = vadd.f32 %v1018_v2, %v924_v9 }
0x12ec   :  { %959 = vst [vmem:[%s1444_s8] sm:$0xff] %v951_v10 }
0x12ef   :  { %v861_v11 = vpop.f32.mrf.mxu3 }
0x12f0   :  { %v927_v12 = vadd.f32 %v926_v5, %v861_v11 }
0x12f2   :  { %v952_v15 = vadd.f32 %v1018_v2, %v927_v12 }
0x12f4   :  { %960 = vst [vmem:[%s1444_s8 + $0x8] sm:$0xff] %v952_v15 }
0x12f7   :  { %v864_v16 = vpop.f32.mrf.mxu3 }
0x12f8   :  { %v930_v17 = vadd.f32 %v929_v13, %v864_v16 }
0x12fa   :  { %v953_v18 = vadd.f32 %v1018_v2, %v930_v17 }
0x12fc   :  { %961 = vst [vmem:[%s1444_s8 + $0x10] sm:$0xff] %v953_v18 }
0x12ff   :  { %v867_v20 = vpop.f32.mrf.mxu3 }
0x1300   :  { %v933_v22 = vadd.f32 %v932_v19, %v867_v20 }
0x1302   :  { %v954_v23 = vadd.f32 %v1018_v2, %v933_v22 }
0x1304   :  { %962 = vst [vmem:[%s1444_s8 + $0x18] sm:$0xff] %v954_v23 }
0x1307   :  { %v870_v25 = vpop.f32.mrf.mxu3 }
0x1308   :  { %v936_v26 = vadd.f32 %v935_v24, %v870_v25 }
0x130a   :  { %v955_v27 = vadd.f32 %v1018_v2, %v936_v26 }
0x130c   :  { %963 = vst [vmem:[%s1444_s8 + $0x20] sm:$0xff] %v955_v27 }
0x130f   :  { %v873_v3 = vpop.f32.mrf.mxu3 }
0x1310   :  { %v939_v4 = vadd.f32 %v938_v29, %v873_v3 }
0x1312   :  { %v956_v30 = vadd.f32 %v1018_v2, %v939_v4 }
0x1314   :  { %964 = vst [vmem:[%s1444_s8 + $0x28] sm:$0xff] %v956_v30 }
0x1317   :  { %v876_v31 = vpop.f32.mrf.mxu3 }
0x1318   :  { %v942_v8 = vadd.f32 %v941_v6, %v876_v31 }
0x131a   :  { %v957_v32 = vadd.f32 %v1018_v2, %v942_v8 }
0x131c   :  { %965 = vst [vmem:[%s1444_s8 + $0x30] sm:$0xff] %v957_v32 }
0x131f   :  { %v879_v33 = vpop.f32.mrf.mxu3 }
0x1320   :  { %v945_v34 = vadd.f32 %v944_v14, %v879_v33 }
0x1322   :  { %v958_v36 = vadd.f32 %v1018_v2, %v945_v34 }
0x1324   :  { %966 = vst [vmem:[%s1444_s8 + $0x38] sm:$0xff] %v958_v36 }

</bundles_post_ra>
